<compile_context>
chip_gen: v7x
topology: tpu7x:2x2x1
jax: 0.10.0
libtpu: 0.0.40
codegen_flags: <defaults>
</compile_context>

<pallas_src>
import functools

import jax
import jax.numpy as jnp
from jax.experimental import pallas as pl
from jax.experimental.pallas import tpu as pltpu

# Full f32 matmul precision everywhere so kernel and pure-JAX reference agree.
jax.config.update("jax_default_matmul_precision", "highest")


# ----------------------------------------------------------------------------
# Fused Pallas kernel: embedding -> 4x GRU cell -> Linear -> log_softmax
# ----------------------------------------------------------------------------
def fused_generator_kernel(*refs, num_layers, hidden_dim, vocab_size):
    """All refs are whole-array VMEM tiles.

    ref order:
      inp      (B, 1)        int32 token ids
      h2d      (B, L*H)      f32 previous hidden, layer-major along lanes
      emb_tbl  (V, E)        f32 embedding table
      wih_l    (Din_l, 3H)   x num_layers   fused input->hidden, gates [r|z|n]
      bi_all   (L, 3H)       fused biases: [bih_r+bhh_r | bih_z+bhh_z | bih_n]
      whh_bd   (L*H, L*3H)   block-diagonal hidden->hidden (all layers, all gates)
      bh_bd    (1, L*3H)     bhh_n per layer in the n-gate columns, zeros elsewhere
      out_w    (H, V)        output projection (pre-transposed)
      out_b    (1, V)
      -- outputs --
      logp     (B, V)        log-probabilities
      hnew2d   (B, L*H)      new hidden state (lane-dense slab)
    """
    H = hidden_dim
    G = 3 * H

    inp_ref, h2d_ref, emb_ref = refs[0], refs[1], refs[2]
    rest = refs[3:]
    wih_refs = rest[:num_layers]
    bi_ref, whh_bd_ref, bh_bd_ref, out_w_ref, out_b_ref = rest[num_layers:num_layers + 5]
    logp_ref, hnew_ref = rest[num_layers + 5], rest[num_layers + 6]

    # ---- embedding lookup as one-hot (B, V) @ (V, E) matmul on the MXU ----
    tok = inp_ref[...]                                        # (B, 1) int32
    b = tok.shape[0]
    one_hot = (jax.lax.broadcasted_iota(jnp.int32, (b, vocab_size), 1)
               == tok).astype(jnp.float32)                    # (B, V)
    x = jnp.dot(one_hot, emb_ref[...],
                preferred_element_type=jnp.float32)           # (B, E)

    # ---- ALL hidden->hidden contributions in one lane-filled matmul -------
    # (off the serial layer chain: depends only on the incoming hidden state)
    h2d = h2d_ref[...]                                        # (B, L*H)
    gh_all = jnp.dot(h2d, whh_bd_ref[...],
                     preferred_element_type=jnp.float32) + bh_bd_ref[...]  # (B, L*3H)

    bi_all = bi_ref[...]                                      # (L, 3H)

    # ---- serial GRU layer chain (only gi dots remain on the chain) --------
    h_new_parts = []
    for layer in range(num_layers):
        gi = jnp.dot(x, wih_refs[layer][...],
                     preferred_element_type=jnp.float32)      # (B, 3H)
        gi = gi + bi_all[layer:layer + 1, :]                  # folded biases
        gh = gh_all[:, layer * G:(layer + 1) * G]             # (B, 3H)

        rz = jax.nn.sigmoid(gi[:, :2 * H] + gh[:, :2 * H])    # (B, 2H)
        r = rz[:, :H]
        z = rz[:, H:]
        n = jnp.tanh(gi[:, 2 * H:] + r * gh[:, 2 * H:])       # bhh_n inside r*(.)
        h_prev = h2d[:, layer * H:(layer + 1) * H]
        h_new = (1.0 - z) * n + z * h_prev

        h_new_parts.append(h_new)
        x = h_new                                             # feed next layer

    # one full-width (B, L*H) store instead of 4 masked 32-lane stores
    hnew_ref[...] = jnp.concatenate(h_new_parts, axis=1)

    # ---- output projection + stable log_softmax ---------------------------
    logits = jnp.dot(x, out_w_ref[...],
                     preferred_element_type=jnp.float32) + out_b_ref[...]
    m = jnp.max(logits, axis=1, keepdims=True)
    shifted = logits - m
    lse = jnp.log(jnp.sum(jnp.exp(shifted), axis=1, keepdims=True))
    logp_ref[...] = shifted - lse


# ----------------------------------------------------------------------------
# Wrapper
# ----------------------------------------------------------------------------
def generator_forward(packed, inp, hidden):
    """Pallas-backed equivalent of Generator.forward (single time step).

    packed: output of pack_generator_params
    inp:    (batch,) int32 token indices
    hidden: (num_layers, batch, hidden_dim) float32
    returns (log_probs (batch, vocab), new_hidden (num_layers, batch, hidden))
    """
    num_layers, batch, hidden_dim = hidden.shape
    vocab_size = packed["out_b"].shape[1]

    inp_2d = inp.reshape(batch, 1).astype(jnp.int32)
    # layer-major lane layout: columns [l*H:(l+1)*H] hold layer l's hidden
    h2d = jnp.transpose(hidden, (1, 0, 2)).reshape(batch, num_layers * hidden_dim)

    kern = functools.partial(fused_generator_kernel, num_layers=num_layers,
                             hidden_dim=hidden_dim, vocab_size=vocab_size)
    vmem = pl.BlockSpec(memory_space=pltpu.MemorySpace.VMEM)

    operands = [inp_2d, h2d, packed["embedding"], *packed["wih"],
                packed["bi_all"], packed["whh_bd"], packed["bh_bd"],
                packed["out_w_t"], packed["out_b"]]

    log_probs, hnew2d = pl.pallas_call(
        kern,
        out_shape=(
            jax.ShapeDtypeStruct((batch, vocab_size), jnp.float32),
            jax.ShapeDtypeStruct((batch, num_layers * hidden_dim), jnp.float32),
        ),
        in_specs=[vmem] * len(operands),
        out_specs=(vmem, vmem),
        input_output_aliases={1: 1},   # reuse the h2d buffer for hnew2d
        compiler_params=pltpu.CompilerParams(vmem_limit_bytes=32 * 1024 * 1024),
    )(*operands)

    new_hidden = jnp.transpose(
        hnew2d.reshape(batch, num_layers, hidden_dim), (1, 0, 2))
    return log_probs, new_hidden


# ----------------------------------------------------------------------------
# Parameter init (uniform(-1/sqrt(H), 1/sqrt(H)) like PyTorch GRU/Linear) and
# packing into the kernel's fused / block-diagonal layout.
# ----------------------------------------------------------------------------
def init_generator_params(key, vocab_size, embedding_dim, hidden_dim, num_layers):
    keys = jax.random.split(key, 1 + 4 * num_layers + 2)
    ki = iter(keys)
    bound = 1.0 / jnp.sqrt(hidden_dim)

    def u(k, shape):
        return jax.random.uniform(k, shape, jnp.float32, -bound, bound)

    params = {
        "embedding": jax.random.normal(next(ki), (vocab_size, embedding_dim),
                                       jnp.float32),
        "gru": [],
    }
    for layer in range(num_layers):
        in_dim = embedding_dim if layer == 0 else hidden_dim
        params["gru"].append({
            # gate order [r, z, n]; weights pre-transposed to (Din, H)
            "wih": u(next(ki), (3, in_dim, hidden_dim)),
            "whh": u(next(ki), (3, hidden_dim, hidden_dim)),
            "bih": u(next(ki), (3, hidden_dim)),
            "bhh": u(next(ki), (3, hidden_dim)),
        })
    params["out_w_t"] = u(next(ki), (hidden_dim, vocab_size))
    params["out_b"] = u(next(ki), (1, vocab_size))
    return params


def pack_generator_params(params, num_layers, hidden_dim):
    """Fuse gates, fold r/z biases, build the block-diagonal whh."""
    H = hidden_dim
    G = 3 * H
    L = num_layers
    packed = {
        "embedding": params["embedding"],
        "out_w_t": params["out_w_t"],
        "out_b": params["out_b"],
    }
    # fused (Din, 3H) input->hidden weights, gate columns [r | z | n]
    packed["wih"] = [
        jnp.concatenate([lp["wih"][0], lp["wih"][1], lp["wih"][2]], axis=1)
        for lp in params["gru"]
    ]
    # folded biases per layer: [bih_r+bhh_r | bih_z+bhh_z | bih_n]
    bi_rows = [
        jnp.concatenate([lp["bih"][0] + lp["bhh"][0],
                         lp["bih"][1] + lp["bhh"][1],
                         lp["bih"][2]], axis=0)
        for lp in params["gru"]
    ]
    packed["bi_all"] = jnp.stack(bi_rows, axis=0)              # (L, 3H)

    # block-diagonal hidden->hidden: rows l*H:(l+1)*H, cols l*3H:(l+1)*3H
    whh_bd = jnp.zeros((L * H, L * G), jnp.float32)
    bh_bd = jnp.zeros((L * G,), jnp.float32)
    for l, lp in enumerate(params["gru"]):
        whh_fused = jnp.concatenate([lp["whh"][0], lp["whh"][1], lp["whh"][2]],
                                    axis=1)                    # (H, 3H)
        whh_bd = whh_bd.at[l * H:(l + 1) * H, l * G:(l + 1) * G].set(whh_fused)
        bh_bd = bh_bd.at[l * G + 2 * H: l * G + 3 * H].set(lp["bhh"][2])
    packed["whh_bd"] = whh_bd                                  # (L*H, L*3H)
    packed["bh_bd"] = bh_bd.reshape(1, L * G)                  # (1, L*3H)
    return packed


# ----------------------------------------------------------------------------
# Pure-JAX reference (for correctness check only; uses the unpacked params)
# ----------------------------------------------------------------------------
def generator_forward_ref(params, inp, hidden):
    x = jnp.take(params["embedding"], inp, axis=0)
    new_hidden = []
    for layer, lp in enumerate(params["gru"]):
        h = hidden[layer]
        gi_r = x @ lp["wih"][0] + lp["bih"][0]
        gi_z = x @ lp["wih"][1] + lp["bih"][1]
        gi_n = x @ lp["wih"][2] + lp["bih"][2]
        gh_r = h @ lp["whh"][0] + lp["bhh"][0]
        gh_z = h @ lp["whh"][1] + lp["bhh"][1]
        gh_n = h @ lp["whh"][2] + lp["bhh"][2]
        r = jax.nn.sigmoid(gi_r + gh_r)
        z = jax.nn.sigmoid(gi_z + gh_z)
        n = jnp.tanh(gi_n + r * gh_n)
        h_new = (1.0 - z) * n + z * h
        new_hidden.append(h_new)
        x = h_new
    logits = x @ params["out_w_t"] + params["out_b"]
    log_probs = jax.nn.log_softmax(logits, axis=1)
    return log_probs, jnp.stack(new_hidden, axis=0)


# ----------------------------------------------------------------------------
if __name__ == "__main__":
    vocab_size = 32
    embedding_dim = 16
    hidden_dim = 32
    num_layers = 4
    batch = 8

    key = jax.random.PRNGKey(0)
    k_params, k_inp1, k_inp2 = jax.random.split(key, 3)

    params = init_generator_params(k_params, vocab_size, embedding_dim,
                                   hidden_dim, num_layers)
    packed = pack_generator_params(params, num_layers, hidden_dim)

    inp1 = jax.random.randint(k_inp1, (batch,), 0, vocab_size, dtype=jnp.int32)
    inp2 = jax.random.randint(k_inp2, (batch,), 0, vocab_size, dtype=jnp.int32)
    hidden0 = jnp.zeros((num_layers, batch, hidden_dim), jnp.float32)  # init_hidden

    # two chained steps: zero hidden, then the produced hidden (recurrence test)
    lp1, h1 = generator_forward(packed, inp1, hidden0)
    lp2, h2 = generator_forward(packed, inp2, h1)
    lp1, h1, lp2, h2 = jax.block_until_ready((lp1, h1, lp2, h2))

    rlp1, rh1 = generator_forward_ref(params, inp1, hidden0)
    rlp2, rh2 = generator_forward_ref(params, inp2, rh1)

    assert lp1.shape == (batch, vocab_size)
    assert h1.shape == (num_layers, batch, hidden_dim)
    for got, ref in ((lp1, rlp1), (h1, rh1), (lp2, rlp2), (h2, rh2)):
        assert jnp.allclose(got, ref, atol=1e-4, rtol=1e-4)

    print("KERNEL_OK")
</pallas_src>

<mosaic_0001>
module attributes {stable_mosaic.version = 11 : i64} {
  func.func @fused_generator_kernel(%arg0: memref<8x1xi32, #tpu.memory_space<vmem>>, %arg1: memref<8x128xf32, #tpu.memory_space<vmem>>, %arg2: memref<32x16xf32, #tpu.memory_space<vmem>>, %arg3: memref<16x96xf32, #tpu.memory_space<vmem>>, %arg4: memref<32x96xf32, #tpu.memory_space<vmem>>, %arg5: memref<32x96xf32, #tpu.memory_space<vmem>>, %arg6: memref<32x96xf32, #tpu.memory_space<vmem>>, %arg7: memref<4x96xf32, #tpu.memory_space<vmem>>, %arg8: memref<128x384xf32, #tpu.memory_space<vmem>>, %arg9: memref<1x384xf32, #tpu.memory_space<vmem>>, %arg10: memref<32x32xf32, #tpu.memory_space<vmem>>, %arg11: memref<1x32xf32, #tpu.memory_space<vmem>>, %arg12: memref<8x32xf32, #tpu.memory_space<vmem>>, %arg13: memref<8x128xf32, #tpu.memory_space<vmem>>) attributes {dimension_semantics = [], scalar_prefetch = 0 : i64, scratch_operands = 0 : i64, tpu.core_type = #tpu.core_type<tc>} {
    %c0 = arith.constant 0 : index
    %c0_0 = arith.constant 0 : index
    %0 = vector.load %arg0[%c0, %c0_0] : memref<8x1xi32, #tpu.memory_space<vmem>>, vector<8x1xi32>
    %1 = tpu.iota {dimensions = array<i32: 1>} : vector<8x32xi32>
    %2 = vector.broadcast %0 : vector<8x1xi32> to vector<8x32xi32>
    %3 = arith.cmpi eq, %1, %2 : vector<8x32xi32>
    %4 = arith.extui %3 : vector<8x32xi1> to vector<8x32xi32>
    %5 = arith.sitofp %4 : vector<8x32xi32> to vector<8x32xf32>
    %c0_1 = arith.constant 0 : index
    %c0_2 = arith.constant 0 : index
    %6 = vector.load %arg2[%c0_1, %c0_2] : memref<32x16xf32, #tpu.memory_space<vmem>>, vector<32x16xf32>
    %cst = arith.constant dense<0.000000e+00> : vector<8x16xf32>
    %7 = tpu.matmul %5, %6, %cst {dimension_numbers = #tpu.dot_dimension_numbers<[1], [0], [0], [1], [0, 0, 1, 1], [], []>, precision = #tpu.contract_precision<fp32>} : vector<8x32xf32>, vector<32x16xf32>, vector<8x16xf32> -> vector<8x16xf32>
    %c0_3 = arith.constant 0 : index
    %c0_4 = arith.constant 0 : index
    %8 = vector.load %arg1[%c0_3, %c0_4] : memref<8x128xf32, #tpu.memory_space<vmem>>, vector<8x128xf32>
    %c0_5 = arith.constant 0 : index
    %c0_6 = arith.constant 0 : index
    %9 = vector.load %arg8[%c0_5, %c0_6] : memref<128x384xf32, #tpu.memory_space<vmem>>, vector<128x384xf32>
    %cst_7 = arith.constant dense<0.000000e+00> : vector<8x384xf32>
    %10 = tpu.matmul %8, %9, %cst_7 {dimension_numbers = #tpu.dot_dimension_numbers<[1], [0], [0], [1], [0, 0, 1, 1], [], []>, precision = #tpu.contract_precision<fp32>} : vector<8x128xf32>, vector<128x384xf32>, vector<8x384xf32> -> vector<8x384xf32>
    %c0_8 = arith.constant 0 : index
    %c0_9 = arith.constant 0 : index
    %11 = vector.load %arg9[%c0_8, %c0_9] : memref<1x384xf32, #tpu.memory_space<vmem>>, vector<1x384xf32>
    %12 = vector.broadcast %11 : vector<1x384xf32> to vector<8x384xf32>
    %13 = arith.addf %10, %12 : vector<8x384xf32>
    %c0_10 = arith.constant 0 : index
    %c0_11 = arith.constant 0 : index
    %14 = vector.load %arg7[%c0_10, %c0_11] : memref<4x96xf32, #tpu.memory_space<vmem>>, vector<4x96xf32>
    %c0_12 = arith.constant 0 : index
    %c0_13 = arith.constant 0 : index
    %15 = vector.load %arg3[%c0_12, %c0_13] : memref<16x96xf32, #tpu.memory_space<vmem>>, vector<16x96xf32>
    %cst_14 = arith.constant dense<0.000000e+00> : vector<8x96xf32>
    %16 = tpu.matmul %7, %15, %cst_14 {dimension_numbers = #tpu.dot_dimension_numbers<[1], [0], [0], [1], [0, 0, 1, 1], [], []>, precision = #tpu.contract_precision<fp32>} : vector<8x16xf32>, vector<16x96xf32>, vector<8x96xf32> -> vector<8x96xf32>
    %17 = vector.extract_strided_slice %14 {offsets = [0, 0], sizes = [1, 96], strides = [1, 1]} : vector<4x96xf32> to vector<1x96xf32>
    %18 = vector.broadcast %17 : vector<1x96xf32> to vector<8x96xf32>
    %19 = arith.addf %16, %18 : vector<8x96xf32>
    %20 = vector.extract_strided_slice %13 {offsets = [0, 0], sizes = [8, 96], strides = [1, 1]} : vector<8x384xf32> to vector<8x96xf32>
    %21 = vector.extract_strided_slice %19 {offsets = [0, 0], sizes = [8, 64], strides = [1, 1]} : vector<8x96xf32> to vector<8x64xf32>
    %22 = vector.extract_strided_slice %20 {offsets = [0, 0], sizes = [8, 64], strides = [1, 1]} : vector<8x96xf32> to vector<8x64xf32>
    %23 = arith.addf %21, %22 : vector<8x64xf32>
    %24 = arith.negf %23 : vector<8x64xf32>
    %25 = math.exp %24 : vector<8x64xf32>
    %cst_15 = arith.constant 1.000000e+00 : f32
    %26 = vector.broadcast %cst_15 : f32 to vector<8x64xf32>
    %27 = arith.addf %26, %25 : vector<8x64xf32>
    %28 = arith.divf %26, %27 : vector<8x64xf32>
    %29 = vector.extract_strided_slice %28 {offsets = [0, 0], sizes = [8, 32], strides = [1, 1]} : vector<8x64xf32> to vector<8x32xf32>
    %30 = vector.extract_strided_slice %28 {offsets = [0, 32], sizes = [8, 32], strides = [1, 1]} : vector<8x64xf32> to vector<8x32xf32>
    %31 = vector.extract_strided_slice %19 {offsets = [0, 64], sizes = [8, 32], strides = [1, 1]} : vector<8x96xf32> to vector<8x32xf32>
    %32 = vector.extract_strided_slice %20 {offsets = [0, 64], sizes = [8, 32], strides = [1, 1]} : vector<8x96xf32> to vector<8x32xf32>
    %33 = arith.mulf %29, %32 : vector<8x32xf32>
    %34 = arith.addf %31, %33 : vector<8x32xf32>
    %35 = math.tanh %34 : vector<8x32xf32>
    %36 = vector.extract_strided_slice %8 {offsets = [0, 0], sizes = [8, 32], strides = [1, 1]} : vector<8x128xf32> to vector<8x32xf32>
    %cst_16 = arith.constant 1.000000e+00 : f32
    %37 = vector.broadcast %cst_16 : f32 to vector<8x32xf32>
    %38 = arith.subf %37, %30 : vector<8x32xf32>
    %39 = arith.mulf %38, %35 : vector<8x32xf32>
    %40 = arith.mulf %30, %36 : vector<8x32xf32>
    %41 = arith.addf %39, %40 : vector<8x32xf32>
    %c0_17 = arith.constant 0 : index
    %c0_18 = arith.constant 0 : index
    %42 = vector.load %arg4[%c0_17, %c0_18] : memref<32x96xf32, #tpu.memory_space<vmem>>, vector<32x96xf32>
    %cst_19 = arith.constant dense<0.000000e+00> : vector<8x96xf32>
    %43 = tpu.matmul %41, %42, %cst_19 {dimension_numbers = #tpu.dot_dimension_numbers<[1], [0], [0], [1], [0, 0, 1, 1], [], []>, precision = #tpu.contract_precision<fp32>} : vector<8x32xf32>, vector<32x96xf32>, vector<8x96xf32> -> vector<8x96xf32>
    %44 = vector.extract_strided_slice %14 {offsets = [1, 0], sizes = [1, 96], strides = [1, 1]} : vector<4x96xf32> to vector<1x96xf32>
    %45 = vector.broadcast %44 : vector<1x96xf32> to vector<8x96xf32>
    %46 = arith.addf %43, %45 : vector<8x96xf32>
    %47 = vector.extract_strided_slice %13 {offsets = [0, 96], sizes = [8, 96], strides = [1, 1]} : vector<8x384xf32> to vector<8x96xf32>
    %48 = vector.extract_strided_slice %46 {offsets = [0, 0], sizes = [8, 64], strides = [1, 1]} : vector<8x96xf32> to vector<8x64xf32>
    %49 = vector.extract_strided_slice %47 {offsets = [0, 0], sizes = [8, 64], strides = [1, 1]} : vector<8x96xf32> to vector<8x64xf32>
    %50 = arith.addf %48, %49 : vector<8x64xf32>
    %51 = arith.negf %50 : vector<8x64xf32>
    %52 = math.exp %51 : vector<8x64xf32>
    %cst_20 = arith.constant 1.000000e+00 : f32
    %53 = vector.broadcast %cst_20 : f32 to vector<8x64xf32>
    %54 = arith.addf %53, %52 : vector<8x64xf32>
    %55 = arith.divf %53, %54 : vector<8x64xf32>
    %56 = vector.extract_strided_slice %55 {offsets = [0, 0], sizes = [8, 32], strides = [1, 1]} : vector<8x64xf32> to vector<8x32xf32>
    %57 = vector.extract_strided_slice %55 {offsets = [0, 32], sizes = [8, 32], strides = [1, 1]} : vector<8x64xf32> to vector<8x32xf32>
    %58 = vector.extract_strided_slice %46 {offsets = [0, 64], sizes = [8, 32], strides = [1, 1]} : vector<8x96xf32> to vector<8x32xf32>
    %59 = vector.extract_strided_slice %47 {offsets = [0, 64], sizes = [8, 32], strides = [1, 1]} : vector<8x96xf32> to vector<8x32xf32>
    %60 = arith.mulf %56, %59 : vector<8x32xf32>
    %61 = arith.addf %58, %60 : vector<8x32xf32>
    %62 = math.tanh %61 : vector<8x32xf32>
    %63 = vector.extract_strided_slice %8 {offsets = [0, 32], sizes = [8, 32], strides = [1, 1]} : vector<8x128xf32> to vector<8x32xf32>
    %cst_21 = arith.constant 1.000000e+00 : f32
    %64 = vector.broadcast %cst_21 : f32 to vector<8x32xf32>
    %65 = arith.subf %64, %57 : vector<8x32xf32>
    %66 = arith.mulf %65, %62 : vector<8x32xf32>
    %67 = arith.mulf %57, %63 : vector<8x32xf32>
    %68 = arith.addf %66, %67 : vector<8x32xf32>
    %c0_22 = arith.constant 0 : index
    %c0_23 = arith.constant 0 : index
    %69 = vector.load %arg5[%c0_22, %c0_23] : memref<32x96xf32, #tpu.memory_space<vmem>>, vector<32x96xf32>
    %cst_24 = arith.constant dense<0.000000e+00> : vector<8x96xf32>
    %70 = tpu.matmul %68, %69, %cst_24 {dimension_numbers = #tpu.dot_dimension_numbers<[1], [0], [0], [1], [0, 0, 1, 1], [], []>, precision = #tpu.contract_precision<fp32>} : vector<8x32xf32>, vector<32x96xf32>, vector<8x96xf32> -> vector<8x96xf32>
    %71 = vector.extract_strided_slice %14 {offsets = [2, 0], sizes = [1, 96], strides = [1, 1]} : vector<4x96xf32> to vector<1x96xf32>
    %72 = vector.broadcast %71 : vector<1x96xf32> to vector<8x96xf32>
    %73 = arith.addf %70, %72 : vector<8x96xf32>
    %74 = vector.extract_strided_slice %13 {offsets = [0, 192], sizes = [8, 96], strides = [1, 1]} : vector<8x384xf32> to vector<8x96xf32>
    %75 = vector.extract_strided_slice %73 {offsets = [0, 0], sizes = [8, 64], strides = [1, 1]} : vector<8x96xf32> to vector<8x64xf32>
    %76 = vector.extract_strided_slice %74 {offsets = [0, 0], sizes = [8, 64], strides = [1, 1]} : vector<8x96xf32> to vector<8x64xf32>
    %77 = arith.addf %75, %76 : vector<8x64xf32>
    %78 = arith.negf %77 : vector<8x64xf32>
    %79 = math.exp %78 : vector<8x64xf32>
    %cst_25 = arith.constant 1.000000e+00 : f32
    %80 = vector.broadcast %cst_25 : f32 to vector<8x64xf32>
    %81 = arith.addf %80, %79 : vector<8x64xf32>
    %82 = arith.divf %80, %81 : vector<8x64xf32>
    %83 = vector.extract_strided_slice %82 {offsets = [0, 0], sizes = [8, 32], strides = [1, 1]} : vector<8x64xf32> to vector<8x32xf32>
    %84 = vector.extract_strided_slice %82 {offsets = [0, 32], sizes = [8, 32], strides = [1, 1]} : vector<8x64xf32> to vector<8x32xf32>
    %85 = vector.extract_strided_slice %73 {offsets = [0, 64], sizes = [8, 32], strides = [1, 1]} : vector<8x96xf32> to vector<8x32xf32>
    %86 = vector.extract_strided_slice %74 {offsets = [0, 64], sizes = [8, 32], strides = [1, 1]} : vector<8x96xf32> to vector<8x32xf32>
    %87 = arith.mulf %83, %86 : vector<8x32xf32>
    %88 = arith.addf %85, %87 : vector<8x32xf32>
    %89 = math.tanh %88 : vector<8x32xf32>
    %90 = vector.extract_strided_slice %8 {offsets = [0, 64], sizes = [8, 32], strides = [1, 1]} : vector<8x128xf32> to vector<8x32xf32>
    %cst_26 = arith.constant 1.000000e+00 : f32
    %91 = vector.broadcast %cst_26 : f32 to vector<8x32xf32>
    %92 = arith.subf %91, %84 : vector<8x32xf32>
    %93 = arith.mulf %92, %89 : vector<8x32xf32>
    %94 = arith.mulf %84, %90 : vector<8x32xf32>
    %95 = arith.addf %93, %94 : vector<8x32xf32>
    %c0_27 = arith.constant 0 : index
    %c0_28 = arith.constant 0 : index
    %96 = vector.load %arg6[%c0_27, %c0_28] : memref<32x96xf32, #tpu.memory_space<vmem>>, vector<32x96xf32>
    %cst_29 = arith.constant dense<0.000000e+00> : vector<8x96xf32>
    %97 = tpu.matmul %95, %96, %cst_29 {dimension_numbers = #tpu.dot_dimension_numbers<[1], [0], [0], [1], [0, 0, 1, 1], [], []>, precision = #tpu.contract_precision<fp32>} : vector<8x32xf32>, vector<32x96xf32>, vector<8x96xf32> -> vector<8x96xf32>
    %98 = vector.extract_strided_slice %14 {offsets = [3, 0], sizes = [1, 96], strides = [1, 1]} : vector<4x96xf32> to vector<1x96xf32>
    %99 = vector.broadcast %98 : vector<1x96xf32> to vector<8x96xf32>
    %100 = arith.addf %97, %99 : vector<8x96xf32>
    %101 = vector.extract_strided_slice %13 {offsets = [0, 288], sizes = [8, 96], strides = [1, 1]} : vector<8x384xf32> to vector<8x96xf32>
    %102 = vector.extract_strided_slice %100 {offsets = [0, 0], sizes = [8, 64], strides = [1, 1]} : vector<8x96xf32> to vector<8x64xf32>
    %103 = vector.extract_strided_slice %101 {offsets = [0, 0], sizes = [8, 64], strides = [1, 1]} : vector<8x96xf32> to vector<8x64xf32>
    %104 = arith.addf %102, %103 : vector<8x64xf32>
    %105 = arith.negf %104 : vector<8x64xf32>
    %106 = math.exp %105 : vector<8x64xf32>
    %cst_30 = arith.constant 1.000000e+00 : f32
    %107 = vector.broadcast %cst_30 : f32 to vector<8x64xf32>
    %108 = arith.addf %107, %106 : vector<8x64xf32>
    %109 = arith.divf %107, %108 : vector<8x64xf32>
    %110 = vector.extract_strided_slice %109 {offsets = [0, 0], sizes = [8, 32], strides = [1, 1]} : vector<8x64xf32> to vector<8x32xf32>
    %111 = vector.extract_strided_slice %109 {offsets = [0, 32], sizes = [8, 32], strides = [1, 1]} : vector<8x64xf32> to vector<8x32xf32>
    %112 = vector.extract_strided_slice %100 {offsets = [0, 64], sizes = [8, 32], strides = [1, 1]} : vector<8x96xf32> to vector<8x32xf32>
    %113 = vector.extract_strided_slice %101 {offsets = [0, 64], sizes = [8, 32], strides = [1, 1]} : vector<8x96xf32> to vector<8x32xf32>
    %114 = arith.mulf %110, %113 : vector<8x32xf32>
    %115 = arith.addf %112, %114 : vector<8x32xf32>
    %116 = math.tanh %115 : vector<8x32xf32>
    %117 = vector.extract_strided_slice %8 {offsets = [0, 96], sizes = [8, 32], strides = [1, 1]} : vector<8x128xf32> to vector<8x32xf32>
    %cst_31 = arith.constant 1.000000e+00 : f32
    %118 = vector.broadcast %cst_31 : f32 to vector<8x32xf32>
    %119 = arith.subf %118, %111 : vector<8x32xf32>
    %120 = arith.mulf %119, %116 : vector<8x32xf32>
    %121 = arith.mulf %111, %117 : vector<8x32xf32>
    %122 = arith.addf %120, %121 : vector<8x32xf32>
    %123 = tpu.concatenate %41, %68, %95, %122 in 1 : vector<8x32xf32>, vector<8x32xf32>, vector<8x32xf32>, vector<8x32xf32> -> vector<8x128xf32>
    %c0_32 = arith.constant 0 : index
    %c0_33 = arith.constant 0 : index
    %124 = vector.load %arg13[%c0_32, %c0_33] : memref<8x128xf32, #tpu.memory_space<vmem>>, vector<8x128xf32>
    tpu.vector_store %arg13[%c0_32, %c0_33], %123 {strides = array<i32>} : memref<8x128xf32, #tpu.memory_space<vmem>>, vector<8x128xf32>,
    %c0_34 = arith.constant 0 : index
    %c0_35 = arith.constant 0 : index
    %125 = vector.load %arg10[%c0_34, %c0_35] : memref<32x32xf32, #tpu.memory_space<vmem>>, vector<32x32xf32>
    %cst_36 = arith.constant dense<0.000000e+00> : vector<8x32xf32>
    %126 = tpu.matmul %122, %125, %cst_36 {dimension_numbers = #tpu.dot_dimension_numbers<[1], [0], [0], [1], [0, 0, 1, 1], [], []>, precision = #tpu.contract_precision<fp32>} : vector<8x32xf32>, vector<32x32xf32>, vector<8x32xf32> -> vector<8x32xf32>
    %c0_37 = arith.constant 0 : index
    %c0_38 = arith.constant 0 : index
    %127 = vector.load %arg11[%c0_37, %c0_38] : memref<1x32xf32, #tpu.memory_space<vmem>>, vector<1x32xf32>
    %128 = vector.broadcast %127 : vector<1x32xf32> to vector<8x32xf32>
    %129 = arith.addf %126, %128 : vector<8x32xf32>
    %cst_39 = arith.constant dense<0xFF800000> : vector<8xf32>
    %130 = vector.multi_reduction <maximumf>, %129, %cst_39 [1] : vector<8x32xf32> to vector<8xf32>
    %131 = vector.shape_cast %130 : vector<8xf32> to vector<8x1xf32>
    %132 = vector.broadcast %131 : vector<8x1xf32> to vector<8x32xf32>
    %133 = arith.subf %129, %132 : vector<8x32xf32>
    %134 = math.exp %133 : vector<8x32xf32>
    %cst_40 = arith.constant dense<0.000000e+00> : vector<8xf32>
    %135 = vector.multi_reduction <add>, %134, %cst_40 [1] : vector<8x32xf32> to vector<8xf32>
    %136 = vector.shape_cast %135 : vector<8xf32> to vector<8x1xf32>
    %137 = math.log %136 : vector<8x1xf32>
    %138 = vector.broadcast %137 : vector<8x1xf32> to vector<8x32xf32>
    %139 = arith.subf %133, %138 : vector<8x32xf32>
    %c0_41 = arith.constant 0 : index
    %c0_42 = arith.constant 0 : index
    %140 = vector.load %arg12[%c0_41, %c0_42] : memref<8x32xf32, #tpu.memory_space<vmem>>, vector<8x32xf32>
    tpu.vector_store %arg12[%c0_41, %c0_42], %139 {strides = array<i32>} : memref<8x32xf32, #tpu.memory_space<vmem>>, vector<8x32xf32>,
    return
  }
}

</mosaic_0001>

<bundles_post_ra>
// kernel: tpu_custom_call.1
= control target key start
LH: loop header
LB: loop body
LE: loop exit
PB: predicated region body
PF: predicated region fallthrough
CT: control target
= control target key end

     0   :  { %19 = vsyncpa [#allocation3], 0  ;;  %s7876_s0 = inlined_call_operand.vmem [shape: s32[8,1], index: 0, kind: input, shape index: {}]   ;;  %s7877_s1 = inlined_call_operand.hbm [shape: f32[8,128], index: 1, kind: input, shape index: {}, may-alias: {1,13}]   ;;  %s7878_s2 = inlined_call_operand.vmem [shape: f32[32,16], index: 2, kind: input, shape index: {}]   ;;  %s7879_s3 = inlined_call_operand.vmem [shape: f32[16,96], index: 3, kind: input, shape index: {}]   ;;  %s7880_s4 = inlined_call_operand.vmem [shape: f32[32,96], index: 4, kind: input, shape index: {}]   ;;  %s7881_s5 = inlined_call_operand.vmem [shape: f32[32,96], index: 5, kind: input, shape index: {}]   ;;  %s7882_s6 = inlined_call_operand.hbm [shape: f32[32,96], index: 6, kind: input, shape index: {}]   ;;  %s7883_s7 = inlined_call_operand.hbm [shape: f32[4,96], index: 7, kind: input, shape index: {}]   ;;  %s7884_s8 = inlined_call_operand.hbm [shape: f32[128,384], index: 8, kind: input, shape index: {}]   ;;  %s7885_s9 = inlined_call_operand.hbm [shape: f32[1,384], index: 9, kind: input, shape index: {}]   ;;  %s7886_s10 = inlined_call_operand.hbm [shape: f32[32,32], index: 10, kind: input, shape index: {}]   ;;  %s7887_s11 = inlined_call_operand.hbm [shape: f32[1,32], index: 11, kind: input, shape index: {}]   ;;  %s7888_s12 = inlined_call_operand.hbm [shape: f32[8,32], index: 12, kind: output, shape index: {0}]   ;;  %s7889_s13 = inlined_call_operand.hbm [shape: f32[8,128], index: 13, kind: output, shape index: {1}, may-alias: {1,13}]  }
   0x1   :  { %20 = vsyncpa [#allocation6], 0 }
   0x2   :  { %21 = vsyncpa [#allocation9], 0 }
   0x3   :  { %22 = vsyncpa [#allocation12], 0 }
   0x4   :  { %23 = vsyncpa [#allocation4], 0 }
   0x5   :  { %24 = vsyncpa [#allocation16], 0  ;;  %s6584_s25 = smov [#allocation5]   ;;  %s6374_s29 = scalar_lea.hbm %s7882_s6, 512 }
   0x6   :  { %s50_s26 = sshll.u32 %s6584_s25, 4  ;;  %p6375_p0 = scmp.ne.s32.totalorder %s7882_s6, %s6374_s29  ;;  %s51_s26 = int_to_ptr.vmem [resolvable:$true] %s50_s26 }
   0x7   :  { %p6378_p1 = scmp.lt.u32.totalorder %s6374_s29, %s7882_s6 }
   0x9   :  { %p6380_p2 = pnand %p6378_p1, %p6375_p0 }
   0xb   :  { %6383 = shalt.err (!%p6380_p2)
}
   0xc   :  { %s6384_s17 = scalar_lea.vmem %s51_s26, 512  ;;  %p6389_p4 = scmp.lt.s32.totalorder %s51_s26, %s51_s26 }
   0xd   :  { %p6385_p3 = scmp.ne.s32.totalorder %s51_s26, %s6384_s17  ;;  %p6390_p5 = scmp.lt.s32.totalorder %s6384_s17, %s6384_s17 }
   0xf   :  { %p6391_p6 = por %p6390_p5, %p6389_p4 }
  0x11   :  { %p6392_p7 = pnand %p6391_p6, %p6385_p3 }
  0x13   :  { %6395 = shalt.err (!%p6392_p7)
}
  0x14   :  { %s6585_s18 = smov 128   ;;  %s6586_s19 = smov 8  }
  0x15   :  { %56 = dma.hbm_to_vmem [thread:$0]  %s7882_s6, 512, %s51_s26, [#allocation6], %s6585_s18, %s6585_s18, %s6586_s19  }
  0x16   :  { %s6587_s22 = smov [#allocation8]   ;;  %s6396_s27 = scalar_lea.hbm %s7884_s8, 6144 }
  0x17   :  { %s72_s23 = sshll.u32 %s6587_s22, 4  ;;  %p6397_p8 = scmp.ne.s32.totalorder %s7884_s8, %s6396_s27  ;;  %s73_s23 = int_to_ptr.vmem [resolvable:$true] %s72_s23 }
  0x18   :  { %p6400_p9 = scmp.lt.u32.totalorder %s6396_s27, %s7884_s8 }
  0x1a   :  { %p6402_p10 = pnand %p6400_p9, %p6397_p8 }
  0x1c   :  { %6405 = shalt.err (!%p6402_p10)
}
  0x1d   :  { %s6406_s15 = scalar_lea.vmem %s73_s23, 6144  ;;  %p6411_p12 = scmp.lt.s32.totalorder %s73_s23, %s73_s23 }
  0x1e   :  { %p6407_p11 = scmp.ne.s32.totalorder %s73_s23, %s6406_s15  ;;  %p6412_p13 = scmp.lt.s32.totalorder %s6406_s15, %s6406_s15 }
  0x20   :  { %p6413_p0 = por %p6412_p13, %p6411_p12 }
  0x22   :  { %p6414_p1 = pnand %p6413_p0, %p6407_p11 }
  0x24   :  { %6417 = shalt.err (!%p6414_p1)
}
  0x25   :  { %s6588_s6 = smov 384   ;;  %s6589_s26 = smov 24  }
  0x26   :  { %78 = dma.hbm_to_vmem [thread:$0]  %s7884_s8, 6144, %s73_s23, [#allocation9], %s6588_s6, %s6588_s6, %s6589_s26  }
  0x27   :  { %s6590_s20 = smov [#allocation11]   ;;  %s6591_s22 = smov [#allocation2]  }
  0x28   :  { %s94_s21 = sshll.u32 %s6590_s20, 4  ;;  %s33_s24 = sshll.u32 %s6591_s22, 4  ;;  %s95_s21 = int_to_ptr.vmem [resolvable:$true] %s94_s21  ;;  %s34_s24 = int_to_ptr.vmem [resolvable:$true] %s33_s24 }
  0x29   :  { %s6418_s28 = scalar_lea.hbm %s7886_s10, 512 }
  0x2a   :  { %p6419_p2 = scmp.ne.s32.totalorder %s7886_s10, %s6418_s28  ;;  %p6422_p3 = scmp.lt.u32.totalorder %s6418_s28, %s7886_s10 }
  0x2c   :  { %p6424_p4 = pnand %p6422_p3, %p6419_p2 }
  0x2e   :  { %6427 = shalt.err (!%p6424_p4)
}
  0x2f   :  { %s6428_s8 = scalar_lea.vmem %s95_s21, 512  ;;  %p6433_p6 = scmp.lt.s32.totalorder %s95_s21, %s95_s21 }
  0x30   :  { %p6429_p5 = scmp.ne.s32.totalorder %s95_s21, %s6428_s8  ;;  %p6434_p7 = scmp.lt.s32.totalorder %s6428_s8, %s6428_s8 }
  0x32   :  { %p6435_p8 = por %p6434_p7, %p6433_p6 }
  0x34   :  { %p6436_p9 = pnand %p6435_p8, %p6429_p5 }
  0x36   :  { %6439 = shalt.err (!%p6436_p9)
}
  0x37   :  { %100 = dma.hbm_to_vmem [thread:$0]  %s7886_s10, 512, %s95_s21, [#allocation12], %s6585_s18, %s6585_s18, %s6586_s19  }
  0x38   :  { %s6440_s17 = scalar_lea.hbm %s7877_s1, 128 }
  0x39   :  { %p6441_p10 = scmp.ne.s32.totalorder %s7877_s1, %s6440_s17  ;;  %p6444_p11 = scmp.lt.u32.totalorder %s6440_s17, %s7877_s1 }
  0x3b   :  { %p6446_p12 = pnand %p6444_p11, %p6441_p10 }
  0x3d   :  { %6449 = shalt.err (!%p6446_p12)
}
  0x3e   :  { %s6450_s28 = scalar_lea.vmem %s34_s24, 128  ;;  %p6455_p0 = scmp.lt.s32.totalorder %s34_s24, %s34_s24 }
  0x3f   :  { %p6451_p13 = scmp.ne.s32.totalorder %s34_s24, %s6450_s28  ;;  %p6456_p1 = scmp.lt.s32.totalorder %s6450_s28, %s6450_s28 }
  0x41   :  { %p6457_p2 = por %p6456_p1, %p6455_p0 }
  0x43   :  { %p6458_p3 = pnand %p6457_p2, %p6451_p13 }
  0x45   :  { %6461 = shalt.err (!%p6458_p3)
}
  0x46   :  { %36 = dma.hbm_to_vmem [thread:$0]  %s7877_s1, 128, %s34_s24, [#allocation3]  }
  0x47   :  { %s6592_s19 = smov [#allocation7]   ;;  %s6593_s29 = smov [#allocation10]  }
  0x48   :  { %s63_s21 = sshll.u32 %s6592_s19, 4  ;;  %s85_s30 = sshll.u32 %s6593_s29, 4  ;;  %s64_s21 = int_to_ptr.vmem [resolvable:$true] %s63_s21  ;;  %s86_s30 = int_to_ptr.vmem [resolvable:$true] %s85_s30 }
  0x49   :  { %s6462_s8 = scalar_lea.hbm %s7883_s7, 64 }
  0x4a   :  { %p6463_p4 = scmp.ne.s32.totalorder %s7883_s7, %s6462_s8  ;;  %p6466_p5 = scmp.lt.u32.totalorder %s6462_s8, %s7883_s7 }
  0x4c   :  { %p6468_p6 = pnand %p6466_p5, %p6463_p4 }
  0x4e   :  { %6471 = shalt.err (!%p6468_p6)
}
  0x4f   :  { %s6472_s1 = scalar_lea.vmem %s64_s21, 64  ;;  %p6477_p8 = scmp.lt.s32.totalorder %s64_s21, %s64_s21 }
  0x50   :  { %p6473_p7 = scmp.ne.s32.totalorder %s64_s21, %s6472_s1  ;;  %p6478_p9 = scmp.lt.s32.totalorder %s6472_s1, %s6472_s1 }
  0x52   :  { %p6479_p10 = por %p6478_p9, %p6477_p8 }
  0x54   :  { %p6480_p11 = pnand %p6479_p10, %p6473_p7 }
  0x56   :  { %6483 = shalt.err (!%p6480_p11)
}
  0x57   :  { %66 = dma.hbm_to_vmem [thread:$0]  %s7883_s7, 64, %s64_s21, [#allocation6]  }
  0x58   :  { %s6484_s25 = scalar_lea.hbm %s7885_s9, 48 }
  0x59   :  { %p6485_p12 = scmp.ne.s32.totalorder %s7885_s9, %s6484_s25  ;;  %p6488_p13 = scmp.lt.u32.totalorder %s6484_s25, %s7885_s9 }
  0x5b   :  { %p6490_p0 = pnand %p6488_p13, %p6485_p12 }
  0x5d   :  { %6493 = shalt.err (!%p6490_p0)
}
  0x5e   :  { %s6494_s19 = scalar_lea.vmem %s86_s30, 48  ;;  %s6498_s29 = scalar_lea.vmem %s86_s30, 64 }
  0x5f   :  { %p6495_p1 = scmp.ne.s32.totalorder %s86_s30, %s6494_s19  ;;  %p6499_p2 = scmp.lt.s32.totalorder %s86_s30, %s86_s30 }
  0x60   :  { %p6500_p3 = scmp.lt.s32.totalorder %s6498_s29, %s6494_s19 }
  0x62   :  { %p6501_p4 = por %p6500_p3, %p6499_p2 }
  0x64   :  { %p6502_p5 = pnand %p6501_p4, %p6495_p1 }
  0x66   :  { %6505 = shalt.err (!%p6502_p5)
}
  0x67   :  { %88 = dma.hbm_to_vmem [thread:$0]  %s7885_s9, 48, %s86_s30, [#allocation9]  }
  0x68   :  { %s6594_s14 = smov [#allocation13]   ;;  %s6506_s6 = scalar_lea.hbm %s7887_s11, 16 }
  0x69   :  { %s107_s15 = sshll.u32 %s6594_s14, 4  ;;  %p6507_p6 = scmp.ne.s32.totalorder %s7887_s11, %s6506_s6  ;;  %s108_s15 = int_to_ptr.vmem [resolvable:$true] %s107_s15 }
  0x6a   :  { %p6510_p7 = scmp.lt.u32.totalorder %s6506_s6, %s7887_s11 }
  0x6c   :  { %p6512_p8 = pnand %p6510_p7, %p6507_p6 }
  0x6e   :  { %6515 = shalt.err (!%p6512_p8)
}
  0x6f   :  { %s6516_s17 = scalar_lea.vmem %s108_s15, 16  ;;  %s6520_s9 = scalar_lea.vmem %s108_s15, 32 }
  0x70   :  { %p6517_p9 = scmp.ne.s32.totalorder %s108_s15, %s6516_s17  ;;  %p6521_p10 = scmp.lt.s32.totalorder %s108_s15, %s108_s15 }
  0x71   :  { %p6522_p11 = scmp.lt.s32.totalorder %s6520_s9, %s6516_s17 }
  0x73   :  { %p6523_p12 = por %p6522_p11, %p6521_p10 }
  0x75   :  { %p6524_p13 = pnand %p6523_p12, %p6517_p9 }
  0x77   :  { %6527 = shalt.err (!%p6524_p13)
}
  0x78   :  { %110 = dma.hbm_to_vmem [thread:$0]  %s7887_s11, 16, %s108_s15, [#allocation12]  }
  0x79   :  { %6572 = dma.done.wait [#allocation3], 128  }
  0x7a   :  { %6573 = vsyncadd [#allocation3], 4294967168 }
  0x7b   :  { %6574 = dma.done.wait [#allocation6], 576  }
  0x7c   :  { %6575 = vsyncadd [#allocation6], 4294966720 }
  0x7d   :  { %6576 = dma.done.wait [#allocation9], 6192  }
  0x7e   :  { %6577 = vsyncadd [#allocation9], 4294961104 }
  0x7f   :  { %6578 = dma.done.wait [#allocation12], 528  }
  0x80   :  { %6579 = vsyncadd [#allocation12], 4294966768  ;;  %v6595_v0 = vmov 0   ;;  %v7893_v1 = vmov 0.0|0.0   ;;  %v132_v2 = vld [vmem:[%s7876_s0] sm:$0xff]  ;;  %v142_v4 = vld [vmem:[%s7878_s2 + $0x8] sm:$0xff]  ;;  %v7890_v51 = vlaneseq }
  0x81   :  { %6343 = vset.pattern.permute.xlu0 %v6595_v0  ;;  %5708 = vmatprep.subr.bf16.mxu0 %v7893_v1  ;;  %v141_v3 = vld [vmem:[%s7878_s2] sm:$0xff]  ;;  %v153_v6 = vand.u32 4294901760, %v142_v4  ;;  %v143_v7 = vld [vmem:[%s7878_s2 + $0x10] sm:$0xff]  ;;  %v144_v8 = vld [vmem:[%s7878_s2 + $0x18] sm:$0xff]  ;;  %vm6597_vm0 = vmmov 0   ;;  %v7896_v11 = vmov 0.0  }
  0x82   :  { %5702 = vmatprep.subr.bf16.mxu1 %v7893_v1  ;;  %136 = vperm.xlu0 %6343, %v132_v2   ;;  %v150_v5 = vand.u32 4294901760, %v141_v3  ;;  %v156_v9 = vand.u32 4294901760, %v143_v7  ;;  %v159_v10 = vand.u32 4294901760, %v144_v8  ;;  %v636_v24 = vld [vmem:[#allocation8 + $0x8] sm:$0xff]  ;;  %v639_v25 = vld [vmem:[#allocation8 + $0x20] sm:$0xff]  ;;  %v134_v52 = vand.u32 127, %v7890_v51 }
  0x83   :  { %5139 = vmatprep.mubr.msk.f32.mxu0 %vm6597_vm0, %v7896_v11  ;;  %5128 = vmatprep.mubr.msk.f32.mxu1 %vm6597_vm0, %v7896_v11  ;;  %v237_v13 = vsub.f32 %v142_v4, %v153_v6  ;;  %v700_v28 = vand.u32 4294901760, %v636_v24  ;;  %v704_v29 = vand.u32 4294901760, %v639_v25  ;;  %vm145_vm1 = vcmask 261120   ;;  %v6831_v55 = vld [vmem:[#allocation8] sm:$0xff]  ;;  %v6833_v56 = vld [vmem:[#allocation8 + $0x18] sm:$0xff]  ;;  %v6841_v59 = vld [vmem:[#allocation8 + $0x50] sm:$0xff] }
  0x84   :  { %v230_v12 = vsub.f32 %v141_v3, %v150_v5  ;;  %v6785_v14 = vpack.c.bf16 %v153_v6, %v150_v5  ;;  %v6787_v15 = vsub.f32 %v143_v7, %v156_v9  ;;  %v6789_v16 = vsub.f32 %v144_v8, %v159_v10  ;;  %v6839_v58 = vld [vmem:[#allocation8 + $0x38] sm:$0xff]  ;;  %v6850_v3 = vld [vmem:[#allocation8 + $0x30] sm:$0xff]  ;;  %v6852_v4 = vld [vmem:[#allocation8 + $0x48] sm:$0xff]  ;;  %s6600_s15 = smov 32   ;;  %s6601_s8 = smov 96  }
  0x85   :  { %v238_v18 = vand.u32 4294901760, %v237_v13  ;;  %v6797_v23 = vpack.c.bf16 %v159_v10, %v156_v9  ;;  %v6802_v34 = vpack.c.bf16 %v704_v29, %v700_v28  ;;  %v6805_v38 = vsub.f32 %v636_v24, %v700_v28  ;;  %v6854_v5 = vld [vmem:[#allocation8 + $0x68] sm:$0xff]  ;;  %v6856_v6 = vld [vmem:[#allocation8 + $0x80] sm:$0xff]  ;;  %v653_v28 = vld [vmem:[#allocation8 + $0x90] sm:$0xff] }
  0x86   :  { %v231_v17 = vand.u32 4294901760, %v230_v12  ;;  %v5715_v19 = vpack.c.bf16 %v237_v13, %v230_v12  ;;  %5704 = vmatpush3.bf16.msra.mxu1 %v6785_v14  ;;  %v245_v20 = vand.u32 4294901760, %v6787_v15  ;;  %v252_v21 = vand.u32 4294901760, %v6789_v16  ;;  %v6935_v51 = vld [vmem:[#allocation8 + $0x140] sm:$0xff] }
  0x87   :  { %5705 = vmatprep.subr.bf16.mxu1 %v7893_v1  ;;  %v5718_v22 = vpack.c.bf16 %v6789_v16, %v6787_v15  ;;  %v239_v27 = vsub.f32 %v237_v13, %v238_v18  ;;  %v6807_v39 = vsub.f32 %v639_v25, %v704_v29  ;;  %v7892_v43 = vand.u32 4294901760, %v6805_v38  ;;  %v656_v29 = vld [vmem:[#allocation8 + $0xa8] sm:$0xff] }
  0x88   :  { %v232_v26 = vsub.f32 %v230_v12, %v231_v17  ;;  %v246_v30 = vsub.f32 %v6787_v15, %v245_v20  ;;  %v253_v31 = vsub.f32 %v6789_v16, %v252_v21  ;;  %v6811_v41 = vpack.c.bf16 %v238_v18, %v231_v17  ;;  %v647_v17 = vld [vmem:[#allocation8 + $0x60] sm:$0xff]  ;;  %v650_v18 = vld [vmem:[#allocation8 + $0x78] sm:$0xff] }
  0x89   :  { %v240_v33 = vand.u32 4294901760, %v239_v27  ;;  %v6813_v42 = vpack.c.bf16 %v252_v21, %v245_v20  ;;  %v811_v44 = vsub.f32 %v6805_v38, %v7892_v43  ;;  %v7891_v45 = vand.u32 4294901760, %v6807_v39  ;;  %v657_v20 = vld [vmem:[#allocation8 + $0xb0] sm:$0xff] }
  0x8a   :  { %v233_v32 = vand.u32 4294901760, %v232_v26  ;;  %5707 = vmatpush3.bf16.msra.mxu1 %v6797_v23  ;;  %v247_v35 = vand.u32 4294901760, %v246_v30  ;;  %v254_v36 = vand.u32 4294901760, %v253_v31  ;;  %v702_v61 = vand.u32 4294901760, %v6831_v55  ;;  %v660_v30 = vld [vmem:[#allocation8 + $0xc8] sm:$0xff]  ;;  %v6877_v31 = vld [vmem:[#allocation8 + $0xe0] sm:$0xff] }
  0x8b   :  { %5739 = vmatprep.subr.bf16.mxu1 %v6802_v34  ;;  %v812_v46 = vand.u32 4294901760, %v811_v44  ;;  %v823_v47 = vsub.f32 %v6807_v39, %v7891_v45  ;;  %v706_v62 = vand.u32 4294901760, %v6833_v56  ;;  %v708_v0 = vand.u32 4294901760, %v6839_v58  ;;  %v659_v44 = vld [vmem:[#allocation8 + $0xc0] sm:$0xff] }
  0x8c   :  { %v5709_v37 = vpack.c.bf16 %v240_v33, %v233_v32  ;;  %v5712_v40 = vpack.c.bf16 %v254_v36, %v247_v35  ;;  %v712_v2 = vand.u32 4294901760, %v6841_v59  ;;  %v710_v9 = vand.u32 4294901760, %v6850_v3 }
  0x8d   :  { %v824_v48 = vand.u32 4294901760, %v823_v47  ;;  %v6859_v8 = vpack.c.bf16 %v706_v62, %v702_v61  ;;  %v714_v10 = vand.u32 4294901760, %v6852_v4  ;;  %v716_v15 = vand.u32 4294901760, %v6854_v5  ;;  %v6889_v47 = vld [vmem:[#allocation8 + $0xf8] sm:$0xff] }
  0x8e   :  { %5710 = vmatpush3.bf16.msra.mxu0 %v5709_v37  ;;  %v6863_v13 = vpack.c.bf16 %v712_v2, %v708_v0  ;;  %v720_v16 = vand.u32 4294901760, %v6856_v6  ;;  %v722_v24 = vand.u32 4294901760, %v650_v18  ;;  %v728_v27 = vand.u32 4294901760, %v657_v20 }
  0x8f   :  { %5711 = vmatprep.subr.bf16.mxu0 %v7893_v1  ;;  %v6823_v49 = vpack.c.bf16 %v824_v48, %v812_v46  ;;  %v6870_v21 = vpack.c.bf16 %v714_v10, %v710_v9  ;;  %v726_v33 = vand.u32 4294901760, %v653_v28  ;;  %v730_v35 = vand.u32 4294901760, %v656_v29  ;;  %v662_v46 = vld [vmem:[#allocation8 + $0xd8] sm:$0xff]  ;;  %v6891_v48 = vld [vmem:[#allocation8 + $0x110] sm:$0xff] }
  0x90   :  { %v6875_v25 = vpack.c.bf16 %v720_v16, %v716_v15  ;;  %v732_v37 = vand.u32 4294901760, %v660_v30  ;;  %v6942_v50 = vsub.f32 %v650_v18, %v722_v24  ;;  %vm2203_vm3 = vcmask 130048  }
  0x91   :  { %vm4291_vm4 = vcmask 523264   ;;  %vm4293_vm5 = vcmask 785408  }
  0x92   :  { %5713 = vmatpush3.bf16.msra.mxu0 %v5712_v40  ;;  %v736_v40 = vand.u32 4294901760, %v6877_v31 }
  0x93   :  { %5714 = vmatprep.subr.bf16.mxu0 %v7893_v1 }
 0x101   :  { %v137_v53 = vpop.permute.xlu0 %136 }
 0x102   :  { %vm138_vm2 = vcmp.eq.s32.totalorder %v134_v52, %v137_v53  ;;  %v6894_v52 = vsub.f32 %v6831_v55, %v702_v61  ;;  %v6897_v53 = vsub.f32 %v6833_v56, %v706_v62  ;;  %v6912_v55 = vpack.c.bf16 %v730_v35, %v726_v33 }
 0x103   :  { %v6829_v54 = vsel %vm138_vm2, 1.0, %v7896_v11  ;;  %v734_v56 = vand.u32 4294901760, %v659_v44  ;;  %v738_v61 = vand.u32 4294901760, %v662_v46  ;;  %v740_v62 = vand.u32 4294901760, %v6889_v47 }
 0x104   :  { %v147_v57 = vsel %vm145_vm1, %v6829_v54, 0  ;;  %5140 = vmatmul.mubr.msk.f32.vlgmr.msra.gmra.mrb[0].mxu0 %vm145_vm1, %v6829_v54  ;;  %7934 = vst [vmem:[#allocation26_spill] sm:$0xff] %v6912_v55 }
 0x105   :  { %v219_v60 = vsub.f32 %v147_v57, %v147_v57  ;;  %5716 = vmatpush3.bf16.msra.mxu0 %v5715_v19  ;;  %5150 = vmatprep.mubr.msk.f32.mxu0 %vm6597_vm0, %v7896_v11  ;;  %v654_v19 = vld [vmem:[#allocation8 + $0x98] sm:$0xff]  ;;  %v6900_v57 = vsub.f32 %v6839_v58, %v708_v0  ;;  %v6915_v58 = vsub.f32 %v6850_v3, %v710_v9  ;;  %v665_v0 = vld [vmem:[#allocation8 + $0xf0] sm:$0xff]  ;;  %v6933_v9 = vld [vmem:[#allocation8 + $0x128] sm:$0xff] }
 0x106   :  { %5717 = vmatprep.subr.bf16.mxu0 %v7893_v1  ;;  %v724_v26 = vand.u32 4294901760, %v654_v19  ;;  %v6931_v3 = vsub.f32 %v6856_v6, %v720_v16  ;;  %v6951_v6 = vld [vmem:[#allocation8 + $0x138] sm:$0xff]  ;;  %v6957_v16 = vpack.c.bf16 %v738_v61, %v734_v56 }
 0x107   :  { %v220_v63 = vand.u32 4294901760, %v219_v60 }
 0x108   :  { %v6886_v36 = vpack.c.bf16 %v728_v27, %v724_v26  ;;  %7936 = vst [vmem:[#allocation28_spill] sm:$0xff] %v6957_v16 }
 0x109   :  { %5719 = vmatpush3.bf16.msra.mxu0 %v5718_v22  ;;  %v221_v7 = vsub.f32 %v219_v60, %v220_v63  ;;  %v718_v22 = vand.u32 4294901760, %v647_v17 }
 0x10a   :  { %5720 = vmatprep.subr.bf16.mxu0 %v7893_v1  ;;  %7932 = vst [vmem:[#allocation24_spill] sm:$0xff] %v6886_v36 }
 0x10b   :  { %v222_v12 = vand.u32 4294901760, %v221_v7  ;;  %v6883_v32 = vpack.c.bf16 %v722_v24, %v718_v22  ;;  %v6925_v7 = vsub.f32 %v6852_v4, %v714_v10  ;;  %v6940_v43 = vsub.f32 %v647_v17, %v718_v22  ;;  %v6949_v10 = vld [vmem:[#allocation8 + $0x120] sm:$0xff] }
 0x10c   :  { %5151 = vmatmul.mubr.f32.vlgmr.msra.gmra.mrb[0].mxu0 %v219_v60  ;;  %v6905_v60 = vld [vmem:[#allocation2] sm:$0xff]  ;;  %v6945_v4 = vsub.f32 %v654_v19, %v724_v26  ;;  %v742_v17 = vand.u32 4294901760, %v665_v0  ;;  %v752_v22 = vand.u32 4294901760, %v6935_v51  ;;  %v6969_v24 = vsub.f32 %v660_v30, %v732_v37 }
 0x10d   :  { %5722 = vmatpush3.bf16.msra.mxu0 %v6785_v14  ;;  %5129 = vmatmul.mubr.f32.vlgmr.msra.gmra.mrb[0].mxu1 %v222_v12  ;;  %7931 = vst [vmem:[#allocation23_spill] sm:$0xff] %v6883_v32  ;;  %7933 = vst [vmem:[#allocation25_spill] sm:$0xff] %v6905_v60  ;;  %v6928_v12 = vsub.f32 %v6854_v5, %v716_v15  ;;  %v6938_v45 = vand.u32 4294901760, %v6905_v60  ;;  %v6947_v5 = vsub.f32 %v657_v20, %v728_v27  ;;  %v7938_v26 = vmov 0.0|0.0  }
 0x10e   :  { %5741 = vmatpush1.bf16.msra.mxu1 %v6859_v8  ;;  %5723 = vmatprep.subr.bf16.mxu0 %v7893_v1  ;;  %v6954_v15 = vsub.f32 %v653_v28, %v726_v33  ;;  %v748_v20 = vand.u32 4294901760, %v6933_v9  ;;  %v6973_v28 = vld [vmem:[#allocation8 + $0x158] sm:$0xff]  ;;  %v6992_v27 = vsub.f32 %v662_v46, %v738_v61  ;;  %v7007_v61 = vld [vmem:[#allocation8 + $0x150] sm:$0xff]  ;;  %v7945_v46 = vand.u32 4294901760, %v6894_v52 }
 0x10f   :  { %5743 = vmatprep.subr.bf16.mxu1 %v6863_v13  ;;  %5161 = vmatprep.mubr.msk.f32.mxu0 %vm6597_vm0, %v7896_v11  ;;  %v6979_v33 = vsub.f32 %v6905_v60, %v6938_v45 }
 0x110   :  { %796 = vmatprep.mubr.f32.mxu1 %v7896_v11 }
 0x111   :  { %5725 = vmatpush3.bf16.msra.mxu0 %v6797_v23  ;;  %v7023_v30 = vand.u32 4294901760, %v6979_v33 }
 0x112   :  { %5745 = vmatpush1.bf16.msra.mxu1 %v6870_v21  ;;  %5726 = vmatprep.subr.bf16.mxu0 %v7893_v1 }
 0x113   :  { %5747 = vmatprep.subr.bf16.mxu1 %v6875_v25  ;;  %7944 = vst [vmem:[#allocation33_spill] sm:$0xff] %v7023_v30 }
 0x114   :  { %5162 = vmatmul.mubr.f32.vlgmr.msra.gmra.mrb[0].mxu0 %v220_v63  ;;  %v6908_v63 = vsub.f32 %v6841_v59, %v712_v2  ;;  %v744_v59 = vand.u32 4294901760, %v6891_v48  ;;  %v6922_v2 = vld [vmem:[#allocation8 + $0x108] sm:$0xff] }
 0x115   :  { %5728 = vmatpush3.bf16.msra.mxu0 %v6811_v41  ;;  %5172 = vmatprep.mubr.msk.f32.mxu0 %vm6597_vm0, %v7896_v11  ;;  %v6918_v41 = vpack.c.bf16 %v736_v40, %v732_v37  ;;  %v746_v18 = vand.u32 4294901760, %v6922_v2 }
 0x116   :  { %5749 = vmatpush1.bf16.msra.mxu1 %v6883_v32  ;;  %5729 = vmatprep.subr.bf16.mxu0 %v7893_v1  ;;  %v6963_v19 = vpack.c.bf16 %v744_v59, %v740_v62  ;;  %v7012_v37 = vsub.f32 %v6891_v48, %v744_v59  ;;  %v7946_v48 = vand.u32 4294901760, %v6897_v53 }
 0x117   :  { %5751 = vmatprep.subr.bf16.mxu1 %v6886_v36  ;;  %7935 = vst [vmem:[#allocation27_spill] sm:$0xff] %v6918_v41  ;;  %v6995_v60 = vpack.c.bf16 %v746_v18, %v742_v17 }
 0x118   :  { %7937 = vst [vmem:[#allocation29_spill] sm:$0xff] %v6963_v19  ;;  %v829_v59 = vsub.f32 %v6897_v53, %v7946_v48  ;;  %v7045_v48 = vsub.f32 %v6922_v2, %v746_v18  ;;  %v800_v2 = vsub.f32 %v6979_v33, %v7023_v30  ;;  %v7959_v30 = vand.u32 4294901760, %v6931_v3 }
 0x119   :  { %5731 = vmatpush3.bf16.msra.mxu0 %v6813_v42  ;;  %v6960_v42 = vsub.f32 %v656_v29, %v730_v35  ;;  %v6975_v29 = vld [vmem:[#allocation8 + $0x170] sm:$0xff]  ;;  %v6983_v35 = vsub.f32 %v6877_v31, %v736_v40  ;;  %7939 = vst [vmem:[#allocation30_spill] sm:$0xff] %v6995_v60  ;;  %v7001_v40 = vsub.f32 %v6889_v47, %v740_v62  ;;  %v7941_v31 = vand.u32 4294901760, %v6949_v10 }
 0x11a   :  { %5753 = vmatpush1.bf16.msra.mxu1 %v6912_v55  ;;  %5732 = vmatprep.subr.bf16.mxu0 %v7893_v1  ;;  %v6985_v1 = vsub.f32 %v659_v44, %v734_v56  ;;  %v7003_v44 = vpack.c.bf16 %v752_v22, %v748_v20  ;;  %v7942_v47 = vand.u32 4294901760, %v6951_v6  ;;  %v817_v56 = vsub.f32 %v6894_v52, %v7945_v46 }
 0x11b   :  { %5755 = vmatprep.subr.bf16.mxu1 %v6918_v41  ;;  %v7948_v46 = vand.u32 4294901760, %v6908_v63  ;;  %v7960_v41 = vand.u32 4294901760, %v6949_v10 }
 0x11c   :  { %5173 = vmatmul.mubr.msk.f32.vlgmr.msra.gmra.mrb[0].mxu0 %vm145_vm1, %v6829_v54  ;;  %7940 = vst [vmem:[#allocation31_spill] sm:$0xff] %v7003_v44  ;;  %v7020_v62 = vpack.c.bf16 %v7942_v47, %v7941_v31  ;;  %v7950_v31 = vand.u32 4294901760, %v6975_v29 }
 0x11d   :  { %5734 = vmatpush3.bf16.msra.mxu0 %v6785_v14  ;;  %5183 = vmatprep.mubr.msk.f32.mxu0 %vm6597_vm0, %v7896_v11  ;;  %v7009_v11 = vld [vmem:[#allocation8 + $0x168] sm:$0xff]  ;;  %v7014_v14 = vsub.f32 %v665_v0, %v742_v17  ;;  %v7949_v17 = vand.u32 4294901760, %v6973_v28 }
 0x11e   :  { %5757 = vmatpush1.bf16.msra.mxu1 %v6957_v16  ;;  %5735 = vmatprep.subr.bf16.mxu0 %v7938_v26  ;;  %7943 = vst [vmem:[#allocation32_spill] sm:$0xff] %v7020_v62  ;;  %v847_v16 = vsub.f32 %v6908_v63, %v7948_v46  ;;  %v7059_v46 = vsub.f32 %v6933_v9, %v748_v20  ;;  %v7955_v20 = vand.u32 4294901760, %v7007_v61 }
 0x11f   :  { %5759 = vmatprep.subr.bf16.mxu1 %v6963_v19  ;;  %v7052_v47 = vpack.c.bf16 %v7950_v31, %v7949_v17  ;;  %v830_v17 = vand.u32 4294901760, %v829_v59  ;;  %v7952_v31 = vand.u32 4294901760, %v6915_v58  ;;  %v7074_v9 = vsub.f32 %v6935_v51, %v752_v22 }
 0x120   :  { %v871_v51 = vsub.f32 %v6931_v3, %v7959_v30 }
 0x121   :  { %5737 = vmatpush3.bf16.msra.mxu0 %v6797_v23  ;;  %v7947_v23 = vand.u32 4294901760, %v6900_v57  ;;  %7951 = vst [vmem:[#allocation34_spill] sm:$0xff] %v7052_v47  ;;  %v841_v0 = vsub.f32 %v6915_v58, %v7952_v31  ;;  %v848_v31 = vand.u32 4294901760, %v847_v16  ;;  %v7097_v16 = vand.u32 4294901760, %v800_v2 }
 0x122   :  { %5761 = vmatpush1.bf16.msra.mxu1 %v6995_v60  ;;  %5930 = vmatprep.subr.bf16.mxu0 %v7938_v26  ;;  %v7954_v60 = vmov 0.0   ;;  %v872_v32 = vand.u32 4294901760, %v871_v51 }
 0x123   :  { %v835_v19 = vsub.f32 %v6900_v57, %v7947_v23  ;;  %5763 = vmatprep.subr.bf16.mxu1 %v7003_v44  ;;  %v818_v44 = vand.u32 4294901760, %v817_v56  ;;  %v7953_v23 = vand.u32 4294901760, %v6925_v7  ;;  %v7956_v56 = vand.u32 4294901760, %v7009_v11  ;;  %7961 = vst [vmem:[#allocation36_spill] sm:$0xff] %v7097_v16 }
 0x124   :  { %5184 = vmatmul.mubr.msk.f32.vlgmr.msra.gmra.mrb[0].mxu0 %vm145_vm1, %v6829_v54  ;;  %v842_v55 = vand.u32 4294901760, %v841_v0  ;;  %v7965_v0 = vand.u32 4294901760, %v6947_v5 }
 0x125   :  { %v853_v54 = vsub.f32 %v6925_v7, %v7953_v23  ;;  %5218 = vmatprep.mubr.msk.f32.mxu0 %vm6597_vm0, %v7954_v60  ;;  %v7081_v59 = vpack.c.bf16 %v7956_v56, %v7955_v20  ;;  %v836_v26 = vand.u32 4294901760, %v835_v19  ;;  %v7958_v23 = vand.u32 4294901760, %v6928_v12 }
 0x126   :  { %5765 = vmatpush1.bf16.msra.mxu1 %v7020_v62  ;;  %v7095_v20 = vsub.f32 %v6949_v10, %v7960_v41  ;;  %v7962_v19 = vand.u32 4294901760, %v6940_v43  ;;  %v5772_v30 = vpack.c.bf16 %v830_v17, %v818_v44  ;;  %v7921_v62 = vand.u32 4294901760, %v6954_v15 }
 0x127   :  { %7957 = vst [vmem:[#allocation35_spill] sm:$0xff] %v7081_v59  ;;  %5767 = vmatprep.subr.bf16.mxu1 %v7052_v47  ;;  %v859_v18 = vsub.f32 %v6928_v12, %v7958_v23  ;;  %v7963_v23 = vand.u32 4294901760, %v6942_v50  ;;  %v854_v22 = vand.u32 4294901760, %v853_v54  ;;  %v5774_v36 = vpack.c.bf16 %v848_v31, %v836_v26 }
 0x128   :  { %v865_v56 = vsub.f32 %v6940_v43, %v7962_v19  ;;  %v7922_v41 = vand.u32 4294901760, %v6960_v42  ;;  %v895_v17 = vsub.f32 %v6947_v5, %v7965_v0  ;;  %v7926_v31 = vand.u32 4294901760, %v6985_v1 }
 0x129   :  { %v877_v47 = vsub.f32 %v6942_v50, %v7963_v23  ;;  %v860_v19 = vand.u32 4294901760, %v859_v18  ;;  %v7964_v23 = vand.u32 4294901760, %v6945_v4  ;;  %v5776_v2 = vpack.c.bf16 %v854_v22, %v842_v55 }
 0x12a   :  { %5769 = vmatpush1.bf16.msra.mxu1 %v7081_v59  ;;  %v866_v54 = vand.u32 4294901760, %v865_v56  ;;  %v7966_v56 = vand.u32 4294901760, %v6969_v24  ;;  %v7967_v0 = vand.u32 4294901760, %v6983_v35  ;;  %v7968_v22 = vand.u32 4294901760, %v6951_v6 }
 0x12b   :  { %5771 = vmatprep.subr.bf16.mxu1 %v6823_v49  ;;  %v883_v44 = vsub.f32 %v6945_v4, %v7964_v23  ;;  %v878_v26 = vand.u32 4294901760, %v877_v47  ;;  %v889_v49 = vsub.f32 %v6954_v15, %v7921_v62  ;;  %v901_v47 = vsub.f32 %v6960_v42, %v7922_v41 }
 0x12c   :  { %v907_v23 = vsub.f32 %v6969_v24, %v7966_v56  ;;  %v919_v55 = vsub.f32 %v6983_v35, %v7967_v0  ;;  %v7138_v62 = vsub.f32 %v6951_v6, %v7968_v22  ;;  %v896_v18 = vand.u32 4294901760, %v895_v17 }
 0x12d   :  { %802 = vmatmul.mubr.f32.vlgmr.msra.gmra.mrb[2].mxu1 %v7097_v16  ;;  %v884_v51 = vand.u32 4294901760, %v883_v44  ;;  %v7969_v41 = vand.u32 4294901760, %v6973_v28  ;;  %v5780_v56 = vpack.c.bf16 %v878_v26, %v866_v54  ;;  %v913_v0 = vsub.f32 %v6985_v1, %v7926_v31 }
 0x12e   :  { %5773 = vmatpush1.bf16.msra.mxu1 %v5772_v30  ;;  %1032 = vmatprep.mubr.f32.mxu1 %v7954_v60  ;;  %v5778_v30 = vpack.c.bf16 %v872_v32, %v860_v19  ;;  %v7970_v16 = vand.u32 4294901760, %v6992_v27  ;;  %v7971_v6 = vand.u32 4294901760, %v7001_v40  ;;  %v890_v44 = vand.u32 4294901760, %v889_v49 }
 0x12f   :  { %5775 = vmatprep.subr.bf16.mxu1 %v5774_v36  ;;  %v7143_v10 = vsub.f32 %v6973_v28, %v7969_v41  ;;  %v7972_v36 = vand.u32 4294901760, %v7012_v37  ;;  %v902_v17 = vand.u32 4294901760, %v901_v47  ;;  %v908_v54 = vand.u32 4294901760, %v907_v23 }
 0x130   :  { %v925_v59 = vsub.f32 %v6992_v27, %v7970_v16  ;;  %v931_v32 = vsub.f32 %v7001_v40, %v7971_v6  ;;  %v920_v26 = vand.u32 4294901760, %v919_v55  ;;  %v7973_v22 = vand.u32 4294901760, %v6975_v29 }
 0x131   :  { %v943_v19 = vsub.f32 %v7012_v37, %v7972_v36  ;;  %v5782_v6 = vpack.c.bf16 %v896_v18, %v884_v51  ;;  %v7927_v31 = vand.u32 4294901760, %v7059_v46  ;;  %v7974_v28 = vand.u32 4294901760, %v7007_v61 }
 0x132   :  { %5777 = vmatpush1.bf16.msra.mxu1 %v5776_v2  ;;  %v7162_v16 = vsub.f32 %v6975_v29, %v7973_v22  ;;  %v7975_v2 = vand.u32 4294901760, %v7009_v11  ;;  %v914_v47 = vand.u32 4294901760, %v913_v0  ;;  %v926_v23 = vand.u32 4294901760, %v925_v59 }
 0x133   :  { %5779 = vmatprep.subr.bf16.mxu1 %v5778_v30  ;;  %v7169_v41 = vsub.f32 %v7007_v61, %v7974_v28  ;;  %v932_v29 = vand.u32 4294901760, %v931_v32  ;;  %v944_v55 = vand.u32 4294901760, %v943_v19  ;;  %v7976_v18 = vand.u32 4294901760, %v7014_v14 }
 0x134   :  { %v7174_v49 = vsub.f32 %v7009_v11, %v7975_v2  ;;  %v7977_v30 = vand.u32 4294901760, %v7045_v48  ;;  %v5784_v61 = vpack.c.bf16 %v902_v17, %v890_v44  ;;  %v5786_v28 = vpack.c.bf16 %v920_v26, %v908_v54 }
 0x135   :  { %v937_v51 = vsub.f32 %v7014_v14, %v7976_v18  ;;  %v960_v36 = vand.u32 4294901760, %v7095_v20  ;;  %v7929_v11 = vand.u32 4294901760, %v7138_v62  ;;  %v955_v59 = vsub.f32 %v7059_v46, %v7927_v31 }
 0x136   :  { %v949_v22 = vsub.f32 %v7045_v48, %v7977_v30  ;;  %5781 = vmatpush1.bf16.msra.mxu1 %v5780_v56  ;;  %v7978_v0 = vand.u32 4294901760, %v7074_v9  ;;  %v7928_v19 = vand.u32 4294901760, %v7143_v10  ;;  %v7930_v2 = vand.u32 4294901760, %v7162_v16 }
 0x137   :  { %5783 = vmatprep.subr.bf16.mxu1 %v5782_v6  ;;  %v5788_v56 = vpack.c.bf16 %v926_v23, %v914_v47  ;;  %v5790_v44 = vpack.c.bf16 %v944_v55, %v932_v29  ;;  %v938_v17 = vand.u32 4294901760, %v937_v51  ;;  %v961_v26 = vsub.f32 %v7095_v20, %v960_v36 }
 0x138   :  { %v967_v32 = vsub.f32 %v7074_v9, %v7978_v0  ;;  %v950_v54 = vand.u32 4294901760, %v949_v22  ;;  %v973_v6 = vsub.f32 %v7138_v62, %v7929_v11  ;;  %v984_v18 = vand.u32 4294901760, %v7169_v41 }
 0x139   :  { %v996_v30 = vand.u32 4294901760, %v7174_v49  ;;  %v956_v0 = vand.u32 4294901760, %v955_v59  ;;  %v979_v47 = vsub.f32 %v7143_v10, %v7928_v19  ;;  %v991_v23 = vsub.f32 %v7162_v16, %v7930_v2 }
 0x13a   :  { %5785 = vmatpush1.bf16.msra.mxu1 %v5784_v61  ;;  %v968_v31 = vand.u32 4294901760, %v967_v32  ;;  %v5792_v29 = vpack.c.bf16 %v950_v54, %v938_v17  ;;  %v962_v55 = vand.u32 4294901760, %v961_v26  ;;  %v974_v51 = vand.u32 4294901760, %v973_v6 }
 0x13b   :  { %5787 = vmatprep.subr.bf16.mxu1 %v5786_v28  ;;  %v985_v22 = vsub.f32 %v7169_v41, %v984_v18  ;;  %v997_v61 = vsub.f32 %v7174_v49, %v996_v30  ;;  %v980_v59 = vand.u32 4294901760, %v979_v47  ;;  %v992_v32 = vand.u32 4294901760, %v991_v23 }
 0x13c   :  { %v5794_v28 = vpack.c.bf16 %v968_v31, %v956_v0  ;;  %v5796_v19 = vpack.c.bf16 %v974_v51, %v962_v55  ;;  %v5804_v54 = vpack.c.bf16 %v6897_v53, %v6894_v52  ;;  %v7979_v26 = vpack.c.bf16 %v6807_v39, %v6805_v38 }
 0x13d   :  { %v986_v11 = vand.u32 4294901760, %v985_v22  ;;  %v998_v2 = vand.u32 4294901760, %v997_v61  ;;  %v5806_v31 = vpack.c.bf16 %v6908_v63, %v6900_v57  ;;  %v5816_v6 = vpack.c.bf16 %v6960_v42, %v6954_v15 }
 0x13e   :  { %5789 = vmatpush1.bf16.msra.mxu1 %v5788_v56  ;;  %v5798_v56 = vpack.c.bf16 %v992_v32, %v980_v59  ;;  %v5818_v0 = vpack.c.bf16 %v6983_v35, %v6969_v24  ;;  %v5820_v47 = vpack.c.bf16 %v6992_v27, %v6985_v1  ;;  %v5822_v23 = vpack.c.bf16 %v7012_v37, %v7001_v40  ;;  %v7981_v59 = vld [vmem:[#allocation24_spill] sm:$0xff]  ;;  %v7982_v32 = vld [vmem:[#allocation26_spill] sm:$0xff] }
 0x13f   :  { %5791 = vmatprep.subr.bf16.mxu1 %v5790_v44  ;;  %v5800_v17 = vpack.c.bf16 %v998_v2, %v986_v11  ;;  %v5808_v44 = vpack.c.bf16 %v6925_v7, %v6915_v58  ;;  %v5810_v11 = vpack.c.bf16 %v6931_v3, %v6928_v12  ;;  %v5814_v2 = vpack.c.bf16 %v6947_v5, %v6945_v4 }
 0x140   :  { %v5826_v55 = vpack.c.bf16 %v7074_v9, %v7059_v46  ;;  %v5828_v51 = vpack.c.bf16 %v7138_v62, %v7095_v20  ;;  %v5830_v22 = vpack.c.bf16 %v7162_v16, %v7143_v10  ;;  %v5832_v61 = vpack.c.bf16 %v7174_v49, %v7169_v41 }
 0x142   :  { %5793 = vmatpush1.bf16.msra.mxu1 %v5792_v29  ;;  %v5824_v29 = vpack.c.bf16 %v7045_v48, %v7014_v14 }
 0x143   :  { %5795 = vmatprep.subr.bf16.mxu1 %v5794_v28  ;;  %v7980_v28 = vld [vmem:[#allocation23_spill] sm:$0xff] }
 0x146   :  { %5797 = vmatpush1.bf16.msra.mxu1 %v5796_v19  ;;  %v5812_v19 = vpack.c.bf16 %v6942_v50, %v6940_v43 }
 0x147   :  { %5799 = vmatprep.subr.bf16.mxu1 %v5798_v56  ;;  %v7983_v56 = vld [vmem:[#allocation27_spill] sm:$0xff] }
 0x14a   :  { %5801 = vmatpush1.bf16.msra.mxu1 %v5800_v17  ;;  %v7984_v17 = vld [vmem:[#allocation28_spill] sm:$0xff] }
 0x14b   :  { %5803 = vmatprep.subr.bf16.mxu1 %v7979_v26  ;;  %v7986_v26 = vld [vmem:[#allocation30_spill] sm:$0xff] }
 0x14d   :  { %1034 = vmatmul.mubr.f32.vlgmr.msra.gmra.mrb[2].mxu1 %v6938_v45 }
 0x14e   :  { %5805 = vmatpush1.bf16.msra.mxu1 %v5804_v54  ;;  %1168 = vmatprep.mubr.f32.mxu1 %v7954_v60  ;;  %v7985_v54 = vld [vmem:[#allocation29_spill] sm:$0xff] }
 0x14f   :  { %5807 = vmatprep.subr.bf16.mxu1 %v5806_v31  ;;  %v7987_v31 = vld [vmem:[#allocation31_spill] sm:$0xff] }
 0x152   :  { %5809 = vmatpush1.bf16.msra.mxu1 %v5808_v44  ;;  %v7988_v44 = vld [vmem:[#allocation32_spill] sm:$0xff] }
 0x153   :  { %5811 = vmatprep.subr.bf16.mxu1 %v5810_v11  ;;  %v7989_v11 = vld [vmem:[#allocation34_spill] sm:$0xff] }
 0x156   :  { %5813 = vmatpush1.bf16.msra.mxu1 %v5812_v19  ;;  %v7990_v19 = vand.u32 4294901760, %v6805_v38  ;;  %v7998_v38 = vand.u32 4294901760, %v6915_v58  ;;  %v8004_v58 = vand.u32 4294901760, %v6945_v4  ;;  %v8011_v4 = vand.u32 4294901760, %v6992_v27 }
 0x157   :  { %5815 = vmatprep.subr.bf16.mxu1 %v5814_v2  ;;  %v7991_v2 = vand.u32 4294901760, %v6807_v39  ;;  %v7999_v39 = vand.u32 4294901760, %v6925_v7  ;;  %v8005_v7 = vand.u32 4294901760, %v6947_v5  ;;  %v8012_v5 = vand.u32 4294901760, %v7001_v40 }
 0x158   :  { %v8018_v27 = vand.u32 4294901760, %v7138_v62  ;;  %v8021_v62 = vmov 0.0|0.0  }
 0x15a   :  { %5817 = vmatpush1.bf16.msra.mxu1 %v5816_v6  ;;  %v5866_v6 = vpack.c.bf16 %v7991_v2, %v7990_v19  ;;  %v5872_v19 = vpack.c.bf16 %v7999_v39, %v7998_v38  ;;  %v5892_v40 = vpack.c.bf16 %v8018_v27, %v960_v36 }
 0x15b   :  { %5819 = vmatprep.subr.bf16.mxu1 %v5818_v0  ;;  %v7992_v0 = vld [vmem:[#allocation35_spill] sm:$0xff] }
 0x15e   :  { %5821 = vmatpush1.bf16.msra.mxu1 %v5820_v47  ;;  %v7993_v47 = vand.u32 4294901760, %v6894_v52  ;;  %v8000_v52 = vand.u32 4294901760, %v6928_v12  ;;  %v8007_v12 = vand.u32 4294901760, %v6960_v42  ;;  %v8014_v42 = vand.u32 4294901760, %v7014_v14 }
 0x15f   :  { %5823 = vmatprep.subr.bf16.mxu1 %v5822_v23  ;;  %v7994_v23 = vand.u32 4294901760, %v6897_v53  ;;  %v8001_v53 = vand.u32 4294901760, %v6931_v3  ;;  %v8008_v3 = vand.u32 4294901760, %v6969_v24  ;;  %v8015_v24 = vand.u32 4294901760, %v7045_v48 }
 0x160   :  { %v8020_v14 = vand.u32 4294901760, %v7162_v16  ;;  %v5896_v48 = vpack.c.bf16 %v996_v30, %v984_v18 }
 0x161   :  { %v5874_v2 = vpack.c.bf16 %v8001_v53, %v8000_v52  ;;  %v5888_v38 = vpack.c.bf16 %v8015_v24, %v8014_v42  ;;  %v8022_v53 = vlaneseq }
 0x162   :  { %5825 = vmatpush1.bf16.msra.mxu1 %v5824_v29  ;;  %v5868_v29 = vpack.c.bf16 %v7994_v23, %v7993_v47  ;;  %v5878_v47 = vpack.c.bf16 %v8005_v7, %v8004_v58  ;;  %v8006_v23 = vand.u32 4294901760, %v6954_v15  ;;  %v8013_v15 = vand.u32 4294901760, %v7012_v37 }
 0x163   :  { %5827 = vmatprep.subr.bf16.mxu1 %v5826_v55  ;;  %v7995_v55 = vand.u32 4294901760, %v6900_v57  ;;  %v8002_v57 = vand.u32 4294901760, %v6940_v43  ;;  %v8009_v43 = vand.u32 4294901760, %v6983_v35  ;;  %v8016_v35 = vand.u32 4294901760, %v7059_v46 }
 0x164   :  { %v8019_v37 = vand.u32 4294901760, %v7143_v10 }
 0x166   :  { %5829 = vmatpush1.bf16.msra.mxu1 %v5828_v51  ;;  %v7996_v51 = vand.u32 4294901760, %v6908_v63  ;;  %v8003_v63 = vand.u32 4294901760, %v6942_v50  ;;  %v8010_v50 = vand.u32 4294901760, %v6985_v1  ;;  %v8017_v1 = vand.u32 4294901760, %v7074_v9 }
 0x167   :  { %5831 = vmatprep.subr.bf16.mxu1 %v5830_v22 }
 0x168   :  { %v5870_v22 = vpack.c.bf16 %v7996_v51, %v7995_v55  ;;  %v5882_v55 = vpack.c.bf16 %v8009_v43, %v8008_v3  ;;  %v5884_v51 = vpack.c.bf16 %v8011_v4, %v8010_v50  ;;  %v5890_v39 = vpack.c.bf16 %v8017_v1, %v8016_v35  ;;  %v7396_v43 = vld [vmem:[#allocation7] sm:$0xf] }
 0x16a   :  { %5833 = vmatpush1.bf16.msra.mxu1 %v5832_v61  ;;  %v7997_v61 = vld [vmem:[#allocation33_spill] sm:$0xff] }
 0x16b   :  { %5835 = vmatprep.subr.bf16.mxu1 %v6802_v34 }
 0x16d   :  { %1171 = vmatmul.mubr.f32.vlgmr.msra.gmra.mrb[2].mxu1 %v6979_v33 }
 0x16e   :  { %5837 = vmatpush1.bf16.msra.mxu1 %v6859_v8  ;;  %1273 = vmatprep.mubr.f32.mxu1 %v7954_v60 }
 0x16f   :  { %5839 = vmatprep.subr.bf16.mxu1 %v6863_v13 }
 0x172   :  { %5841 = vmatpush1.bf16.msra.mxu1 %v6870_v21 }
 0x173   :  { %5843 = vmatprep.subr.bf16.mxu1 %v6875_v25 }
 0x176   :  { %5845 = vmatpush1.bf16.msra.mxu1 %v7980_v28 }
 0x177   :  { %5847 = vmatprep.subr.bf16.mxu1 %v7981_v59 }
 0x17a   :  { %5849 = vmatpush1.bf16.msra.mxu1 %v7982_v32 }
 0x17b   :  { %5851 = vmatprep.subr.bf16.mxu1 %v7983_v56 }
 0x17e   :  { %5853 = vmatpush1.bf16.msra.mxu1 %v7984_v17 }
 0x17f   :  { %5855 = vmatprep.subr.bf16.mxu1 %v7985_v54 }
 0x182   :  { %5857 = vmatpush1.bf16.msra.mxu1 %v7986_v26 }
 0x183   :  { %5859 = vmatprep.subr.bf16.mxu1 %v7987_v31 }
 0x186   :  { %5861 = vmatpush1.bf16.msra.mxu1 %v7988_v44 }
 0x187   :  { %5863 = vmatprep.subr.bf16.mxu1 %v7989_v11 }
 0x18a   :  { %5865 = vmatpush1.bf16.msra.mxu1 %v7992_v0 }
 0x18b   :  { %5867 = vmatprep.subr.bf16.mxu1 %v5866_v6  ;;  %v5876_v6 = vpack.c.bf16 %v8003_v63, %v8002_v57  ;;  %v7381_v63 = vld [vmem:[#allocation10] sm:$0x7] }
 0x18d   :  { %1277 = vmatmul.mubr.f32.vlgmr.msra.gmra.mrb[2].mxu1 %v7997_v61 }
 0x18e   :  { %5869 = vmatpush1.bf16.msra.mxu1 %v5868_v29  ;;  %1443 = vmatprep.mubr.f32.mxu1 %v7954_v60  ;;  %v5880_v29 = vpack.c.bf16 %v8007_v12, %v8006_v23  ;;  %v8023_v12 = vld [vmem:[#allocation25_spill] sm:$0xff] }
 0x18f   :  { %5871 = vmatprep.subr.bf16.mxu1 %v5870_v22  ;;  %v5886_v22 = vpack.c.bf16 %v8013_v15, %v8012_v5 }
 0x192   :  { %5873 = vmatpush1.bf16.msra.mxu1 %v5872_v19  ;;  %v5894_v19 = vpack.c.bf16 %v8020_v14, %v8019_v37  ;;  %v2697_v37 = vld [vmem:[%s7880_s4 + $0x8] sm:$0xff] }
 0x193   :  { %5875 = vmatprep.subr.bf16.mxu1 %v5874_v2  ;;  %v7378_v2 = vshrl.u32 %v8022_v53, 7 }
 0x195   :  { %v687_v57 = vsub.s32 0, %v7378_v2  ;;  %v691_v23 = vsub.s32 1, %v7378_v2 }
 0x196   :  { %5877 = vmatpush1.bf16.msra.mxu1 %v5876_v6 }
 0x197   :  { %5879 = vmatprep.subr.bf16.mxu1 %v5878_v47  ;;  %v688_v6 = vrot.slane %v7381_v63, %v687_v57 }
 0x19a   :  { %5881 = vmatpush1.bf16.msra.mxu1 %v5880_v29  ;;  %v692_v29 = vrot.slane %v7381_v63, %v691_v23 }
 0x19b   :  { %5883 = vmatprep.subr.bf16.mxu1 %v5882_v55  ;;  %v2202_v55 = vrot.slane %v7396_v43, %v687_v57 }
 0x19e   :  { %5885 = vmatpush1.bf16.msra.mxu1 %v5884_v51 }
 0x19f   :  { %5887 = vmatprep.subr.bf16.mxu1 %v5886_v22 }
 0x1a2   :  { %5889 = vmatpush1.bf16.msra.mxu1 %v5888_v38 }
 0x1a3   :  { %5891 = vmatprep.subr.bf16.mxu1 %v5890_v39 }
 0x1a6   :  { %5893 = vmatpush1.bf16.msra.mxu1 %v5892_v40  ;;  %v2696_v40 = vld [vmem:[%s7880_s4] sm:$0xff] }
 0x1a7   :  { %5895 = vmatprep.subr.bf16.mxu1 %v5894_v19  ;;  %v2710_v14 = vand.u32 4294901760, %v2696_v40  ;;  %v2713_v19 = vand.u32 4294901760, %v2697_v37 }
 0x1aa   :  { %5897 = vmatpush1.bf16.msra.mxu1 %v5896_v48  ;;  %v7407_v48 = vpack.c.bf16 %v2713_v19, %v2710_v14 }
 0x1ab   :  { %5899 = vmatprep.subr.bf16.mxu1 %v6802_v34  ;;  %v2197_v34 = vld [vmem:[%s7879_s3] sm:$0xff] }
 0x1ad   :  { %1445 = vmatmul.mubr.f32.vlgmr.msra.gmra.mrb[2].mxu1 %v6938_v45 }
 0x1ae   :  { %5901 = vmatpush1.bf16.msra.mxu1 %v6859_v8  ;;  %1547 = vmatprep.mubr.f32.mxu1 %v7954_v60  ;;  %v2198_v8 = vld [vmem:[%s7879_s3 + $0x8] sm:$0xff]  ;;  %s6599_s3 = smov 64  }
 0x1af   :  { %5903 = vmatprep.subr.bf16.mxu1 %v6863_v13  ;;  %v2208_v13 = vand.u32 4294901760, %v2197_v34 }
 0x1b1   :  { %v2286_v20 = vsub.f32 %v2197_v34, %v2208_v13  ;;  %v2790_v34 = vsub.f32 %v2696_v40, %v2710_v14  ;;  %v652_v40 = vld [vmem:[#allocation8 + $0x88] sm:$0xff] }
 0x1b2   :  { %5905 = vmatpush1.bf16.msra.mxu1 %v6870_v21  ;;  %v2211_v21 = vand.u32 4294901760, %v2198_v8 }
 0x1b3   :  { %5907 = vmatprep.subr.bf16.mxu1 %v6875_v25  ;;  %v2287_v41 = vand.u32 4294901760, %v2286_v20 }
 0x1b4   :  { %v6075_v25 = vpack.c.bf16 %v2211_v21, %v2208_v13  ;;  %v2293_v10 = vsub.f32 %v2198_v8, %v2211_v21  ;;  %v2797_v8 = vsub.f32 %v2697_v37, %v2713_v19  ;;  %v2698_v13 = vld [vmem:[%s7880_s4 + $0x10] sm:$0xff]  ;;  %v2699_v21 = vld [vmem:[%s7880_s4 + $0x18] sm:$0xff] }
 0x1b6   :  { %5909 = vmatpush1.bf16.msra.mxu1 %v7980_v28  ;;  %v2294_v16 = vand.u32 4294901760, %v2293_v10  ;;  %v2288_v28 = vsub.f32 %v2286_v20, %v2287_v41 }
 0x1b7   :  { %5911 = vmatprep.subr.bf16.mxu1 %v7981_v59 }
 0x1b8   :  { %v2295_v59 = vsub.f32 %v2293_v10, %v2294_v16  ;;  %v6087_v52 = vpack.c.bf16 %v2294_v16, %v2287_v41 }
 0x1ba   :  { %5913 = vmatpush1.bf16.msra.mxu1 %v7982_v32 }
 0x1bb   :  { %5915 = vmatprep.subr.bf16.mxu1 %v7983_v56 }
 0x1be   :  { %5917 = vmatpush1.bf16.msra.mxu1 %v7984_v17  ;;  %v2289_v17 = vand.u32 4294901760, %v2288_v28 }
 0x1bf   :  { %5919 = vmatprep.subr.bf16.mxu1 %v7985_v54  ;;  %v2296_v54 = vand.u32 4294901760, %v2295_v59 }
 0x1c2   :  { %5921 = vmatpush1.bf16.msra.mxu1 %v7986_v26 }
 0x1c3   :  { %5923 = vmatprep.subr.bf16.mxu1 %v7987_v31 }
 0x1c6   :  { %5925 = vmatpush1.bf16.msra.mxu1 %v7988_v44  ;;  %v6078_v44 = vpack.c.bf16 %v2296_v54, %v2289_v17 }
 0x1c7   :  { %5927 = vmatprep.subr.bf16.mxu1 %v7989_v11 }
 0x1ca   :  { %5929 = vmatpush1.bf16.msra.mxu1 %v7992_v0  ;;  %v6081_v0 = vpack.c.bf16 %v2293_v10, %v2286_v20  ;;  %v2798_v20 = vand.u32 4294901760, %v2797_v8 }
 0x1cb   :  { %6074 = vmatprep.subr.bf16.mxu1 %v8021_v62 }
 0x1cc   :  { %v2799_v59 = vsub.f32 %v2797_v8, %v2798_v20 }
 0x1cd   :  { %1549 = vmatmul.mubr.f32.vlgmr.msra.gmra.mrb[2].mxu1 %v6938_v45 }
 0x1ce   :  { %6076 = vmatpush3.bf16.msra.mxu1 %v6075_v25  ;;  %5400 = vmatprep.mubr.msk.f32.mxu1 %vm6597_vm0, %v7954_v60 }
 0x1cf   :  { %6077 = vmatprep.subr.bf16.mxu1 %v8021_v62 }
 0x1e0   :  { %v224_v46 = vpop.f32.mrb[0].mxu1 }
 0x1e1   :  { %v5130_v9 = vpop.f32.mrb[1].mxu1 }
 0x1e2   :  { %v2791_v9 = vand.u32 4294901760, %v2790_v34 }
 0x1f7   :  { %v630_v36 = vpop.f32.mrb[0].mxu0 }
 0x1f8   :  { %v6236_v49 = vadd.f32 %v630_v36, %v224_v46  ;;  %v5185_v18 = vpop.f32.mrb[1].mxu0  ;;  %v2719_v46 = vand.u32 4294901760, %v2699_v21 }
 0x1f9   :  { %v2792_v18 = vsub.f32 %v2790_v34, %v2791_v9 }
 0x1fa   :  { %v2205_v30 = vsel %vm2203_vm3, %v6236_v49, 0  ;;  %v2811_v49 = vsub.f32 %v2699_v21, %v2719_v46 }
 0x1fb   :  { %v2274_v32 = vand.u32 4294901760, %v2205_v30 }
 0x1fc   :  { %v2812_v54 = vand.u32 4294901760, %v2811_v49 }
 0x1fd   :  { %v2275_v56 = vsub.f32 %v2205_v30, %v2274_v32 }
 0x1ff   :  { %v2276_v26 = vand.u32 4294901760, %v2275_v56 }
 0x201   :  { %v2277_v31 = vsub.f32 %v2275_v56, %v2276_v26 }
 0x203   :  { %v2278_v11 = vand.u32 4294901760, %v2277_v31 }
 0x205   :  { %5401 = vmatmul.mubr.f32.vlgmr.msra.gmra.mrb[4].mxu1 %v2278_v11  ;;  %v2813_v11 = vsub.f32 %v2811_v49, %v2812_v54 }
 0x206   :  { %6079 = vmatpush3.bf16.msra.mxu1 %v6078_v44  ;;  %5407 = vmatprep.mubr.msk.f32.mxu1 %vm6597_vm0, %v7954_v60 }
 0x207   :  { %6080 = vmatprep.subr.bf16.mxu1 %v8021_v62  ;;  %v2814_v53 = vand.u32 4294901760, %v2813_v11  ;;  %v679_v11 = vld [vmem:[#allocation8 + $0x160] sm:$0xff] }
 0x20d   :  { %5408 = vmatmul.mubr.f32.vlgmr.msra.gmra.mrb[4].mxu1 %v2274_v32 }
 0x20e   :  { %6082 = vmatpush3.bf16.msra.mxu1 %v6081_v0  ;;  %5414 = vmatprep.mubr.msk.f32.mxu1 %vm6597_vm0, %v7954_v60 }
 0x20f   :  { %6083 = vmatprep.subr.bf16.mxu1 %v8021_v62 }
 0x215   :  { %5415 = vmatmul.mubr.f32.vlgmr.msra.gmra.mrb[4].mxu1 %v2275_v56  ;;  %v2793_v56 = vand.u32 4294901760, %v2792_v18 }
 0x216   :  { %6085 = vmatpush3.bf16.msra.mxu1 %v6075_v25  ;;  %5421 = vmatprep.mubr.msk.f32.mxu1 %vm6597_vm0, %v7954_v60 }
 0x217   :  { %6086 = vmatprep.subr.bf16.mxu1 %v8021_v62 }
 0x21d   :  { %5422 = vmatmul.mubr.f32.vlgmr.msra.gmra.mrb[4].mxu1 %v2276_v26  ;;  %v2800_v26 = vand.u32 4294901760, %v2799_v59 }
 0x21e   :  { %6088 = vmatpush3.bf16.msra.mxu1 %v6087_v52  ;;  %5428 = vmatprep.mubr.msk.f32.mxu1 %vm6597_vm0, %v7954_v60 }
 0x21f   :  { %6089 = vmatprep.subr.bf16.mxu1 %v8021_v62  ;;  %v6099_v0 = vpack.c.bf16 %v2800_v26, %v2793_v56  ;;  %v676_v56 = vld [vmem:[#allocation8 + $0x148] sm:$0xff] }
 0x225   :  { %5429 = vmatmul.mubr.f32.vlgmr.msra.gmra.mrb[4].mxu1 %v2274_v32 }
 0x226   :  { %6091 = vmatpush3.bf16.msra.mxu1 %v6075_v25  ;;  %5435 = vmatprep.mubr.msk.f32.mxu1 %vm6597_vm0, %v7954_v60  ;;  %v2716_v25 = vand.u32 4294901760, %v2698_v13 }
 0x227   :  { %6092 = vmatprep.subr.bf16.mxu1 %v8021_v62 }
 0x228   :  { %v6096_v16 = vpack.c.bf16 %v2719_v46, %v2716_v25  ;;  %v2804_v36 = vsub.f32 %v2698_v13, %v2716_v25  ;;  %v661_v46 = vld [vmem:[#allocation8 + $0xd0] sm:$0xff] }
 0x22a   :  { %v2805_v17 = vand.u32 4294901760, %v2804_v36 }
 0x22c   :  { %v2806_v44 = vsub.f32 %v2804_v36, %v2805_v17 }
 0x22d   :  { %5436 = vmatmul.mubr.f32.vlgmr.msra.gmra.mrb[4].mxu1 %v2274_v32 }
 0x22e   :  { %5446 = vmatprep.mubr.msk.f32.mxu1 %vm6597_vm0, %v7954_v60  ;;  %6094 = vmatpush3.bf16.msra.mxu1 %v7407_v48  ;;  %v2807_v52 = vand.u32 4294901760, %v2806_v44  ;;  %v1595_v44 = vand.u32 4294901760, %v676_v56 }
 0x22f   :  { %6095 = vmatprep.subr.bf16.mxu1 %v8021_v62 }
 0x230   :  { %v6102_v57 = vpack.c.bf16 %v2814_v53, %v2807_v52 }
 0x232   :  { %6097 = vmatpush3.bf16.msra.mxu1 %v6096_v16 }
 0x233   :  { %6098 = vmatprep.subr.bf16.mxu1 %v8021_v62 }
 0x2a0   :  { %v1550_v58 = vpop.f32.mrb[2].mxu1 }
 0x2a1   :  { %v6237_v7 = vadd.f32 %v1550_v58, %v688_v6  ;;  %v1552_v47 = vpop.f32.mrb[3].mxu1  ;;  %v6105_v6 = vpack.c.bf16 %v2797_v8, %v2790_v34  ;;  %v6108_v58 = vpack.c.bf16 %v2811_v49, %v2804_v36  ;;  %v655_v34 = vld [vmem:[#allocation8 + $0xa0] sm:$0xff]  ;;  %v658_v8 = vld [vmem:[#allocation8 + $0xb8] sm:$0xff] }
 0x2a2   :  { %v7392_v3 = vadd.f32 %v1552_v47, %v692_v29  ;;  %v6120_v47 = vpack.c.bf16 %v2812_v54, %v2805_v17  ;;  %v1574_v21 = vand.u32 4294901760, %v655_v34  ;;  %v1577_v25 = vand.u32 4294901760, %v658_v8  ;;  %v670_v36 = vld [vmem:[#allocation8 + $0x118] sm:$0xff] }
 0x2a3   :  { %2674 = vrot.lane.b32.xlu0 %v6237_v7, %s6599_s3  ;;  %v1589_v59 = vand.u32 4294901760, %v670_v36 }
 0x2a7   :  { %2691 = vrot.lane.b32.xlu0 %v8023_v12, %s6600_s15 }
 0x2ab   :  { %3195 = vrot.lane.b32.xlu0 %v6237_v7, %s6600_s15 }
 0x2af   :  { %3208 = vrot.lane.b32.xlu0 %v7392_v3, %s6601_s8 }
 0x300   :  { %v2662_v50 = vpop.f32.mrb[4].mxu1 }
 0x301   :  { %v6240_v4 = vadd.f32 %v2662_v50, %v2202_v55  ;;  %v5437_v51 = vpop.f32.mrb[5].mxu1 }
 0x303   :  { %v2666_v5 = vadd.f32 %v6240_v4, %v6237_v7  ;;  %v6117_v7 = vpack.c.bf16 %v2798_v20, %v2791_v9  ;;  %v664_v9 = vld [vmem:[#allocation8 + $0xe8] sm:$0xff]  ;;  %v7460_v20 = vpack.c.bf16 %v1577_v25, %v1574_v21 }
 0x305   :  { %v4845_v15 = vmul.f32 -1.442695, %v2666_v5 }
 0x307   :  { %6344 = vpow2.f32 %v4845_v15  ;;  %v637_v15 = vld [vmem:[#allocation8 + $0x10] sm:$0xff] }
 0x311   :  { %v6345_v22 = vpop.eup %6344 }
 0x312   :  { %v2670_v42 = vadd.f32 1.0, %v6345_v22  ;;  %v640_v22 = vld [vmem:[#allocation8 + $0x28] sm:$0xff] }
 0x314   :  { %6346 = vrcp.f32 %v2670_v42  ;;  %v643_v42 = vld [vmem:[#allocation8 + $0x40] sm:$0xff] }
 0x315   :  { %v2675_v38 = vpop.permute.xlu0 %2674 }
 0x319   :  { %v2692_v41 = vpop.permute.xlu0 %2691 }
 0x31e   :  { %v6347_v24 = vpop.eup %6346 }
 0x31f   :  { %v2677_v35 = vmul.f32 %v6347_v24, %v2675_v38  ;;  %v2684_v10 = vsub.f32 1.0, %v6347_v24  ;;  %v2694_v30 = vmul.f32 %v6347_v24, %v2692_v41  ;;  %v1556_v24 = vand.u32 4294901760, %v637_v15 }
 0x320   :  { %v1559_v38 = vand.u32 4294901760, %v640_v22  ;;  %v1583_v41 = vand.u32 4294901760, %v664_v9 }
 0x321   :  { %2679 = vrot.lane.b32.xlu1 %v2677_v35, %s6599_s3  ;;  %v646_v35 = vld [vmem:[#allocation8 + $0x58] sm:$0xff]  ;;  %v7463_v49 = vsub.f32 %v637_v15, %v1556_v24 }
 0x322   :  { %v7449_v37 = vpack.c.bf16 %v1559_v38, %v1556_v24  ;;  %v7465_v18 = vsub.f32 %v640_v22, %v1559_v38 }
 0x323   :  { %v1649_v52 = vand.u32 4294901760, %v7463_v49 }
 0x324   :  { %5932 = vmatpush3.bf16.msra.mxu0 %v7449_v37  ;;  %v1656_v53 = vand.u32 4294901760, %v7465_v18 }
 0x325   :  { %5933 = vmatprep.subr.bf16.mxu0 %v8021_v62 }
 0x393   :  { %v2680_v1 = vpop.permute.xlu1 %2679 }
 0x394   :  { %v2682_v39 = vadd.f32 %v6240_v4, %v2680_v1  ;;  %v1562_v1 = vand.u32 4294901760, %v643_v42 }
 0x396   :  { %6348 = vtanh.f32 %v2682_v39  ;;  %v1565_v39 = vand.u32 4294901760, %v646_v35  ;;  %v7471_v17 = vsub.f32 %v643_v42, %v1562_v1 }
 0x398   :  { %v7452_v14 = vpack.c.bf16 %v1565_v39, %v1562_v1  ;;  %v7473_v54 = vsub.f32 %v646_v35, %v1565_v39 }
 0x39a   :  { %5935 = vmatpush3.bf16.msra.mxu0 %v7452_v14 }
 0x39b   :  { %5936 = vmatprep.subr.bf16.mxu0 %v8021_v62 }
 0x3a0   :  { %v6349_v27 = vpop.eup %6348 }
 0x3a1   :  { %2686 = vrot.lane.b32.xlu1 %v6349_v27, %s6601_s8  ;;  %v649_v27 = vld [vmem:[#allocation8 + $0x70] sm:$0xff] }
 0x3a2   :  { %v1568_v19 = vand.u32 4294901760, %v649_v27 }
 0x413   :  { %v2687_v28 = vpop.permute.xlu1 %2686 }
 0x414   :  { %v2689_v32 = vmul.f32 %v2687_v28, %v2684_v10  ;;  %v1580_v10 = vand.u32 4294901760, %v661_v46 }
 0x416   :  { %v2695_v31 = vadd.f32 %v2694_v30, %v2689_v32  ;;  %v7468_v30 = vpack.c.bf16 %v1583_v41, %v1580_v10  ;;  %v673_v32 = vld [vmem:[#allocation8 + $0x130] sm:$0xff]  ;;  %v7513_v39 = vsub.f32 %v661_v46, %v1580_v10  ;;  %v8024_v10 = vld [vmem:[#allocation36_spill] sm:$0xff] }
 0x417   :  { %v1592_v26 = vand.u32 4294901760, %v673_v32 }
 0x418   :  { %2705 = vrot.lane.b32.xlu1 %v2695_v31, %s6601_s8 }
 0x41c   :  { %3197 = vrot.lane.b32.xlu1 %v7392_v3, %s6600_s15 }
 0x48a   :  { %v7421_v12 = vpop.permute.xlu1 %2705 }
 0x48b   :  { %v2707_v29 = vsel %vm145_vm1, %v7421_v12, 0 }
 0x48c   :  { %v2778_v55 = vand.u32 4294901760, %v2707_v29 }
 0x48e   :  { %v2779_v50 = vsub.f32 %v2707_v29, %v2778_v55 }
 0x490   :  { %v2780_v4 = vand.u32 4294901760, %v2779_v50 }
 0x492   :  { %v2781_v51 = vsub.f32 %v2779_v50, %v2780_v4 }
 0x494   :  { %v2782_v5 = vand.u32 4294901760, %v2781_v51  ;;  %v7497_v51 = vsub.f32 %v655_v34, %v1574_v21 }
 0x496   :  { %5447 = vmatmul.mubr.f32.vlgmr.msra.gmra.mrb[6].mxu1 %v2782_v5  ;;  %v7499_v5 = vsub.f32 %v658_v8, %v1577_v25 }
 0x497   :  { %6100 = vmatpush3.bf16.msra.mxu1 %v6099_v0  ;;  %5457 = vmatprep.mubr.msk.f32.mxu1 %vm6597_vm0, %v7954_v60  ;;  %v682_v0 = vld [vmem:[#allocation8 + $0x178] sm:$0xff] }
 0x498   :  { %6101 = vmatprep.subr.bf16.mxu1 %v8021_v62 }
 0x49b   :  { %6103 = vmatpush3.bf16.msra.mxu1 %v6102_v57  ;;  %v7481_v57 = vsub.f32 %v649_v27, %v1568_v19  ;;  %v7515_v27 = vsub.f32 %v664_v9, %v1583_v41  ;;  %v7529_v9 = vsub.f32 %v670_v36, %v1589_v59  ;;  %v7543_v36 = vsub.f32 %v673_v32, %v1592_v26 }
 0x49c   :  { %6104 = vmatprep.subr.bf16.mxu1 %v8021_v62 }
 0x49d   :  { %v1677_v35 = vand.u32 4294901760, %v7481_v57 }
 0x49e   :  { %5458 = vmatmul.mubr.f32.vlgmr.msra.gmra.mrb[6].mxu1 %v2778_v55 }
 0x49f   :  { %6106 = vmatpush3.bf16.msra.mxu1 %v6105_v6  ;;  %5468 = vmatprep.mubr.msk.f32.mxu1 %vm6597_vm0, %v7954_v60  ;;  %v1598_v6 = vand.u32 4294901760, %v679_v11  ;;  %v1678_v21 = vsub.f32 %v7481_v57, %v1677_v35 }
 0x4a0   :  { %6107 = vmatprep.subr.bf16.mxu1 %v8021_v62 }
 0x4a1   :  { %v7556_v32 = vsub.f32 %v679_v11, %v1598_v6 }
 0x4a3   :  { %6109 = vmatpush3.bf16.msra.mxu1 %v6108_v58  ;;  %v1601_v58 = vand.u32 4294901760, %v682_v0 }
 0x4a4   :  { %6110 = vmatprep.subr.bf16.mxu1 %v8021_v62 }
 0x4a5   :  { %v7501_v15 = vpack.c.bf16 %v1601_v58, %v1598_v6  ;;  %v1747_v6 = vand.u32 4294901760, %v7556_v32 }
 0x4a6   :  { %5469 = vmatmul.mubr.f32.vlgmr.msra.gmra.mrb[6].mxu1 %v2779_v50  ;;  %v1650_v50 = vsub.f32 %v7463_v49, %v1649_v52 }
 0x4a7   :  { %6112 = vmatpush3.bf16.msra.mxu1 %v7407_v48  ;;  %5479 = vmatprep.mubr.msk.f32.mxu1 %vm6597_vm0, %v7954_v60 }
 0x4a8   :  { %6113 = vmatprep.subr.bf16.mxu1 %v8021_v62  ;;  %v1651_v24 = vand.u32 4294901760, %v1650_v50 }
 0x4ab   :  { %6115 = vmatpush3.bf16.msra.mxu1 %v6096_v16 }
 0x4ac   :  { %6116 = vmatprep.subr.bf16.mxu1 %v8021_v62 }
 0x4ae   :  { %5480 = vmatmul.mubr.f32.vlgmr.msra.gmra.mrb[6].mxu1 %v2780_v4  ;;  %v1657_v4 = vsub.f32 %v7465_v18, %v1656_v53 }
 0x4af   :  { %6118 = vmatpush3.bf16.msra.mxu1 %v6117_v7  ;;  %5490 = vmatprep.mubr.msk.f32.mxu1 %vm6597_vm0, %v7954_v60  ;;  %v1663_v7 = vand.u32 4294901760, %v7471_v17 }
 0x4b0   :  { %6119 = vmatprep.subr.bf16.mxu1 %v8021_v62  ;;  %v1658_v38 = vand.u32 4294901760, %v1657_v4  ;;  %v1705_v4 = vand.u32 4294901760, %v7513_v39 }
 0x4b1   :  { %v1664_v22 = vsub.f32 %v7471_v17, %v1663_v7 }
 0x4b2   :  { %v5955_v34 = vpack.c.bf16 %v1658_v38, %v1651_v24 }
 0x4b3   :  { %6121 = vmatpush3.bf16.msra.mxu1 %v6120_v47  ;;  %v1670_v47 = vand.u32 4294901760, %v7473_v54 }
 0x4b4   :  { %6122 = vmatprep.subr.bf16.mxu1 %v8021_v62 }
 0x4b5   :  { %v1671_v42 = vsub.f32 %v7473_v54, %v1670_v47 }
 0x4b6   :  { %5491 = vmatmul.mubr.f32.vlgmr.msra.gmra.mrb[6].mxu1 %v2778_v55 }
 0x4b7   :  { %6124 = vmatpush3.bf16.msra.mxu1 %v7407_v48  ;;  %5501 = vmatprep.mubr.msk.f32.mxu1 %vm6597_vm0, %v7954_v60  ;;  %v1571_v48 = vand.u32 4294901760, %v652_v40  ;;  %v1672_v8 = vand.u32 4294901760, %v1671_v42  ;;  %v1679_v42 = vand.u32 4294901760, %v1678_v21  ;;  %v1726_v21 = vand.u32 4294901760, %v7529_v9 }
 0x4b8   :  { %6125 = vmatprep.subr.bf16.mxu1 %v8021_v62 }
 0x4b9   :  { %v7456_v13 = vpack.c.bf16 %v1571_v48, %v1568_v19  ;;  %v7485_v29 = vsub.f32 %v652_v40, %v1571_v48  ;;  %v1665_v40 = vand.u32 4294901760, %v1664_v22  ;;  %v1691_v19 = vand.u32 4294901760, %v7497_v51 }
 0x4ba   :  { %v1698_v48 = vand.u32 4294901760, %v7499_v5 }
 0x4bb   :  { %6127 = vmatpush3.bf16.msra.mxu1 %v6096_v16  ;;  %5938 = vmatpush3.bf16.msra.mxu0 %v7456_v13  ;;  %v667_v16 = vld [vmem:[#allocation8 + $0x100] sm:$0xff]  ;;  %v1684_v1 = vand.u32 4294901760, %v7485_v29  ;;  %v1692_v41 = vsub.f32 %v7497_v51, %v1691_v19  ;;  %v5958_v22 = vpack.c.bf16 %v1672_v8, %v1665_v40  ;;  %v1706_v40 = vsub.f32 %v7513_v39, %v1705_v4 }
 0x4bc   :  { %6164 = vmatprep.subr.bf16.mxu1 %v8021_v62  ;;  %5939 = vmatprep.subr.bf16.mxu0 %v8021_v62  ;;  %v1586_v28 = vand.u32 4294901760, %v667_v16  ;;  %v1699_v50 = vsub.f32 %v7499_v5, %v1698_v48 }
 0x4bd   :  { %v1685_v25 = vsub.f32 %v7485_v29, %v1684_v1 }
 0x4be   :  { %5502 = vmatmul.mubr.f32.vlgmr.msra.gmra.mrb[6].mxu1 %v2778_v55  ;;  %v7476_v31 = vpack.c.bf16 %v1589_v59, %v1586_v28  ;;  %v7488_v55 = vpack.c.bf16 %v1595_v44, %v1592_v26  ;;  %v7527_v46 = vsub.f32 %v667_v16, %v1586_v28  ;;  %v1712_v16 = vand.u32 4294901760, %v7515_v27 }
 0x4bf   :  { %5578 = vmatprep.mubr.msk.f32.mxu1 %vm6597_vm0, %v7954_v60  ;;  %5941 = vmatpush3.bf16.msra.mxu0 %v7460_v20  ;;  %v1686_v24 = vand.u32 4294901760, %v1685_v25  ;;  %v7545_v28 = vsub.f32 %v676_v56, %v1595_v44  ;;  %v1693_v59 = vand.u32 4294901760, %v1692_v41  ;;  %v1700_v38 = vand.u32 4294901760, %v1699_v50 }
 0x4c0   :  { %5942 = vmatprep.subr.bf16.mxu0 %v8021_v62  ;;  %v1713_v8 = vsub.f32 %v7515_v27, %v1712_v16  ;;  %v7558_v56 = vsub.f32 %v682_v0, %v1601_v58  ;;  %v1733_v25 = vand.u32 4294901760, %v7543_v36  ;;  %v1707_v41 = vand.u32 4294901760, %v1706_v40 }
 0x4c1   :  { %v5964_v26 = vpack.c.bf16 %v1700_v38, %v1693_v59 }
 0x4c2   :  { %v1714_v50 = vand.u32 4294901760, %v1713_v8  ;;  %v1734_v0 = vsub.f32 %v7543_v36, %v1733_v25  ;;  %v1754_v38 = vand.u32 4294901760, %v7558_v56 }
 0x4c3   :  { %5944 = vmatpush3.bf16.msra.mxu0 %v7468_v30 }
 0x4c4   :  { %5945 = vmatprep.subr.bf16.mxu0 %v8021_v62  ;;  %v5967_v58 = vpack.c.bf16 %v1714_v50, %v1707_v41 }
 0x4c7   :  { %5947 = vmatpush3.bf16.msra.mxu0 %v7476_v31 }
 0x4c8   :  { %5948 = vmatprep.subr.bf16.mxu0 %v8021_v62 }
 0x4cb   :  { %5950 = vmatpush3.bf16.msra.mxu0 %v7488_v55 }
 0x4cc   :  { %5951 = vmatprep.subr.bf16.mxu0 %v8021_v62 }
 0x4cf   :  { %5953 = vmatpush3.bf16.msra.mxu0 %v7501_v15 }
 0x4d0   :  { %5954 = vmatprep.subr.bf16.mxu0 %v8021_v62 }
 0x4d2   :  { %5219 = vmatmul.mubr.f32.vlgmr.msra.gmra.mrb[2].mxu0 %v8024_v10  ;;  %v1719_v10 = vand.u32 4294901760, %v7527_v46 }
 0x4d3   :  { %5956 = vmatpush3.bf16.msra.mxu0 %v5955_v34  ;;  %5253 = vmatprep.mubr.msk.f32.mxu0 %vm6597_vm0, %v7954_v60  ;;  %v5961_v34 = vpack.c.bf16 %v1686_v24, %v1679_v42  ;;  %v1740_v42 = vand.u32 4294901760, %v7545_v28 }
 0x4d4   :  { %5957 = vmatprep.subr.bf16.mxu0 %v8021_v62  ;;  %v1720_v44 = vsub.f32 %v7527_v46, %v1719_v10 }
 0x4d5   :  { %v1741_v59 = vsub.f32 %v7545_v28, %v1740_v42 }
 0x4d6   :  { %v1721_v11 = vand.u32 4294901760, %v1720_v44  ;;  %v1748_v44 = vsub.f32 %v7556_v32, %v1747_v6 }
 0x4d7   :  { %5959 = vmatpush3.bf16.msra.mxu0 %v5958_v22  ;;  %v1727_v22 = vsub.f32 %v7529_v9, %v1726_v21  ;;  %v1742_v8 = vand.u32 4294901760, %v1741_v59  ;;  %v5988_v59 = vpack.c.bf16 %v7499_v5, %v7497_v51 }
 0x4d8   :  { %5960 = vmatprep.subr.bf16.mxu0 %v8021_v62  ;;  %v1749_v50 = vand.u32 4294901760, %v1748_v44  ;;  %v2703_v44 = vrot.slane %v7396_v43, %v691_v23 }
 0x4d9   :  { %v1728_v24 = vand.u32 4294901760, %v1727_v22 }
 0x4db   :  { %5962 = vmatpush3.bf16.msra.mxu0 %v5961_v34  ;;  %v1735_v34 = vand.u32 4294901760, %v1734_v0  ;;  %v5970_v40 = vpack.c.bf16 %v1728_v24, %v1721_v11  ;;  %v5979_v11 = vpack.c.bf16 %v7465_v18, %v7463_v49  ;;  %v5985_v24 = vpack.c.bf16 %v7485_v29, %v7481_v57 }
 0x4dc   :  { %5963 = vmatprep.subr.bf16.mxu0 %v8021_v62  ;;  %v6036_v49 = vpack.c.bf16 %v1698_v48, %v1691_v19  ;;  %v6039_v18 = vpack.c.bf16 %v1712_v16, %v1705_v4  ;;  %v7733_v19 = vld [vmem:[#allocation2] sm:$0xff] }
 0x4dd   :  { %v5973_v41 = vpack.c.bf16 %v1742_v8, %v1735_v34  ;;  %v5991_v34 = vpack.c.bf16 %v7515_v27, %v7513_v39  ;;  %v5997_v8 = vpack.c.bf16 %v7545_v28, %v7543_v36 }
 0x4df   :  { %5965 = vmatpush3.bf16.msra.mxu0 %v5964_v26  ;;  %v1755_v26 = vsub.f32 %v7558_v56, %v1754_v38 }
 0x4e0   :  { %5966 = vmatprep.subr.bf16.mxu0 %v8021_v62 }
 0x4e1   :  { %v1756_v22 = vand.u32 4294901760, %v1755_v26  ;;  %v6000_v26 = vpack.c.bf16 %v7558_v56, %v7556_v32 }
 0x4e3   :  { %5968 = vmatpush3.bf16.msra.mxu0 %v5967_v58  ;;  %v5976_v0 = vpack.c.bf16 %v1756_v22, %v1749_v50  ;;  %v5982_v58 = vpack.c.bf16 %v7473_v54, %v7471_v17  ;;  %v3196_v22 = vpop.permute.xlu0 %3195  ;;  %v6042_v17 = vpack.c.bf16 %v1726_v21, %v1719_v10  ;;  %v6045_v54 = vpack.c.bf16 %v1740_v42, %v1733_v25 }
 0x4e4   :  { %5969 = vmatprep.subr.bf16.mxu0 %v8021_v62 }
 0x4e7   :  { %5971 = vmatpush3.bf16.msra.mxu0 %v5970_v40  ;;  %v5994_v40 = vpack.c.bf16 %v7529_v9, %v7527_v46 }
 0x4e8   :  { %5972 = vmatprep.subr.bf16.mxu0 %v8021_v62 }
 0x4eb   :  { %5974 = vmatpush3.bf16.msra.mxu0 %v5973_v41  ;;  %v3198_v41 = vpop.permute.xlu1 %3197 }
 0x4ec   :  { %5975 = vmatprep.subr.bf16.mxu0 %v8021_v62 }
 0x4ef   :  { %5977 = vmatpush3.bf16.msra.mxu0 %v5976_v0 }
 0x4f0   :  { %5978 = vmatprep.subr.bf16.mxu0 %v8021_v62 }
 0x4f2   :  { %5254 = vmatmul.mubr.f32.vlgmr.msra.gmra.mrb[2].mxu0 %v6938_v45 }
 0x4f3   :  { %5980 = vmatpush3.bf16.msra.mxu0 %v5979_v11  ;;  %5288 = vmatprep.mubr.msk.f32.mxu0 %vm6597_vm0, %v7954_v60 }
 0x4f4   :  { %5981 = vmatprep.subr.bf16.mxu0 %v8021_v62 }
 0x4f7   :  { %5983 = vmatpush3.bf16.msra.mxu0 %v5982_v58  ;;  %v3199_v58 = vsel %vm145_vm1, %v3196_v22, %v3198_v41 }
 0x4f8   :  { %5984 = vmatprep.subr.bf16.mxu0 %v8021_v62 }
 0x4fb   :  { %5986 = vmatpush3.bf16.msra.mxu0 %v5985_v24 }
 0x4fc   :  { %5987 = vmatprep.subr.bf16.mxu0 %v8021_v62 }
 0x4ff   :  { %5989 = vmatpush3.bf16.msra.mxu0 %v5988_v59 }
 0x500   :  { %5990 = vmatprep.subr.bf16.mxu0 %v8021_v62 }
 0x503   :  { %5992 = vmatpush3.bf16.msra.mxu0 %v5991_v34 }
 0x504   :  { %5993 = vmatprep.subr.bf16.mxu0 %v8021_v62 }
 0x507   :  { %5995 = vmatpush3.bf16.msra.mxu0 %v5994_v40  ;;  %v3209_v40 = vpop.permute.xlu0 %3208 }
 0x508   :  { %5996 = vmatprep.subr.bf16.mxu0 %v8021_v62 }
 0x50b   :  { %5998 = vmatpush3.bf16.msra.mxu0 %v5997_v8 }
 0x50c   :  { %5999 = vmatprep.subr.bf16.mxu0 %v8021_v62 }
 0x50f   :  { %6001 = vmatpush3.bf16.msra.mxu0 %v6000_v26  ;;  %v6030_v26 = vpack.c.bf16 %v1670_v47, %v1663_v7  ;;  %v3228_v47 = vld [vmem:[%s7881_s5 + $0x10] sm:$0xff] }
 0x510   :  { %6002 = vmatprep.subr.bf16.mxu0 %v8021_v62  ;;  %v3246_v29 = vand.u32 4294901760, %v3228_v47 }
 0x512   :  { %5289 = vmatmul.mubr.f32.vlgmr.msra.gmra.mrb[2].mxu0 %v6979_v33 }
 0x513   :  { %6004 = vmatpush3.bf16.msra.mxu0 %v7449_v37  ;;  %5323 = vmatprep.mubr.msk.f32.mxu0 %vm6597_vm0, %v7954_v60 }
 0x514   :  { %6005 = vmatprep.subr.bf16.mxu0 %v8021_v62 }
 0x517   :  { %6007 = vmatpush3.bf16.msra.mxu0 %v7452_v14 }
 0x518   :  { %6008 = vmatprep.subr.bf16.mxu0 %v8021_v62 }
 0x51b   :  { %6010 = vmatpush3.bf16.msra.mxu0 %v7456_v13 }
 0x51c   :  { %6011 = vmatprep.subr.bf16.mxu0 %v8021_v62 }
 0x51f   :  { %6013 = vmatpush3.bf16.msra.mxu0 %v7460_v20 }
 0x520   :  { %6014 = vmatprep.subr.bf16.mxu0 %v8021_v62 }
 0x523   :  { %6016 = vmatpush3.bf16.msra.mxu0 %v7468_v30 }
 0x524   :  { %6017 = vmatprep.subr.bf16.mxu0 %v8021_v62 }
 0x527   :  { %6019 = vmatpush3.bf16.msra.mxu0 %v7476_v31 }
 0x528   :  { %6020 = vmatprep.subr.bf16.mxu0 %v8021_v62 }
 0x52b   :  { %6022 = vmatpush3.bf16.msra.mxu0 %v7488_v55 }
 0x52c   :  { %6023 = vmatprep.subr.bf16.mxu0 %v8021_v62 }
 0x52f   :  { %6025 = vmatpush3.bf16.msra.mxu0 %v7501_v15 }
 0x530   :  { %6026 = vmatprep.subr.bf16.mxu0 %v8021_v62 }
 0x532   :  { %5324 = vmatmul.mubr.f32.vlgmr.msra.gmra.mrb[2].mxu0 %v7997_v61  ;;  %v6033_v61 = vpack.c.bf16 %v1684_v1, %v1677_v35  ;;  %v3334_v1 = vsub.f32 %v3228_v47, %v3246_v29 }
 0x533   :  { %5358 = vmatprep.mubr.msk.f32.mxu0 %vm6597_vm0, %v7954_v60 }
 0x534   :  { %v3335_v36 = vand.u32 4294901760, %v3334_v1 }
 0x536   :  { %v3336_v32 = vsub.f32 %v3334_v1, %v3335_v36 }
 0x538   :  { %v3337_v42 = vand.u32 4294901760, %v3336_v32 }
 0x591   :  { %v3190_v50 = vpop.f32.mrb[6].mxu1 }
 0x592   :  { %v7617_v0 = vadd.f32 %v3190_v50, %v2703_v44  ;;  %v5503_v11 = vpop.f32.mrb[7].mxu1  ;;  %v6027_v44 = vpack.c.bf16 %v1656_v53, %v1649_v52  ;;  %v6048_v52 = vpack.c.bf16 %v1754_v38, %v1747_v6 }
 0x594   :  { %v3201_v24 = vadd.f32 %v7617_v0, %v3199_v58  ;;  %6028 = vmatpush3.bf16.msra.mxu0 %v6027_v44  ;;  %v695_v44 = vsub.s32 2, %v7378_v2 }
 0x595   :  { %6029 = vmatprep.subr.bf16.mxu0 %v8021_v62 }
 0x596   :  { %v4846_v23 = vmul.f32 -1.442695, %v3201_v24 }
 0x598   :  { %6350 = vpow2.f32 %v4846_v23  ;;  %6031 = vmatpush3.bf16.msra.mxu0 %v6030_v26  ;;  %v3233_v26 = vrot.slane %v7396_v43, %v695_v44 }
 0x599   :  { %6032 = vmatprep.subr.bf16.mxu0 %v8021_v62 }
 0x59c   :  { %6034 = vmatpush3.bf16.msra.mxu0 %v6033_v61 }
 0x59d   :  { %6035 = vmatprep.subr.bf16.mxu0 %v8021_v62 }
 0x5a0   :  { %6037 = vmatpush3.bf16.msra.mxu0 %v6036_v49 }
 0x5a1   :  { %6038 = vmatprep.subr.bf16.mxu0 %v8021_v62 }
 0x5a2   :  { %v6351_v59 = vpop.eup %6350 }
 0x5a3   :  { %v3205_v34 = vadd.f32 1.0, %v6351_v59 }
 0x5a4   :  { %6040 = vmatpush3.bf16.msra.mxu0 %v6039_v18 }
 0x5a5   :  { %6352 = vrcp.f32 %v3205_v34  ;;  %6041 = vmatprep.subr.bf16.mxu0 %v8021_v62 }
 0x5a8   :  { %6043 = vmatpush3.bf16.msra.mxu0 %v6042_v17 }
 0x5a9   :  { %6044 = vmatprep.subr.bf16.mxu0 %v8021_v62 }
 0x5ac   :  { %6046 = vmatpush3.bf16.msra.mxu0 %v6045_v54 }
 0x5ad   :  { %6047 = vmatprep.subr.bf16.mxu0 %v8021_v62 }
 0x5af   :  { %v7637_v33 = vpop.eup %6352 }
 0x5b0   :  { %v3211_v8 = vmul.f32 %v7637_v33, %v3209_v40  ;;  %6049 = vmatpush3.bf16.msra.mxu0 %v6048_v52  ;;  %v3224_v48 = vmul.f32 %v7733_v19, %v7637_v33 }
 0x5b1   :  { %6050 = vmatprep.subr.bf16.mxu0 %v8021_v62 }
 0x5b2   :  { %3213 = vrot.lane.b32.xlu1 %v3211_v8, %s6599_s3 }
 0x5b3   :  { %5359 = vmatmul.mubr.f32.vlgmr.msra.gmra.mrb[2].mxu0 %v6938_v45 }
 0x5b4   :  { %6052 = vmatpush3.bf16.msra.mxu0 %v7449_v37  ;;  %5393 = vmatprep.mubr.msk.f32.mxu0 %vm6597_vm0, %v7954_v60 }
 0x5b5   :  { %6053 = vmatprep.subr.bf16.mxu0 %v8021_v62 }
 0x5b8   :  { %6055 = vmatpush3.bf16.msra.mxu0 %v7452_v14 }
 0x5b9   :  { %6056 = vmatprep.subr.bf16.mxu0 %v8021_v62 }
 0x5bc   :  { %6058 = vmatpush3.bf16.msra.mxu0 %v7456_v13 }
 0x5bd   :  { %6059 = vmatprep.subr.bf16.mxu0 %v8021_v62 }
 0x5c0   :  { %6061 = vmatpush3.bf16.msra.mxu0 %v7460_v20  ;;  %v3226_v20 = vld [vmem:[%s7881_s5] sm:$0xff] }
 0x5c1   :  { %6062 = vmatprep.subr.bf16.mxu0 %v8021_v62 }
 0x5c4   :  { %6064 = vmatpush3.bf16.msra.mxu0 %v7468_v30  ;;  %v3240_v30 = vand.u32 4294901760, %v3226_v20 }
 0x5c5   :  { %6065 = vmatprep.subr.bf16.mxu0 %v8021_v62 }
 0x5c6   :  { %v3320_v57 = vsub.f32 %v3226_v20, %v3240_v30 }
 0x5c8   :  { %6067 = vmatpush3.bf16.msra.mxu0 %v7476_v31  ;;  %v3321_v51 = vand.u32 4294901760, %v3320_v57 }
 0x5c9   :  { %6068 = vmatprep.subr.bf16.mxu0 %v8021_v62 }
 0x5ca   :  { %v3322_v27 = vsub.f32 %v3320_v57, %v3321_v51 }
 0x5cc   :  { %6070 = vmatpush3.bf16.msra.mxu0 %v7488_v55  ;;  %v3323_v16 = vand.u32 4294901760, %v3322_v27 }
 0x5cd   :  { %6071 = vmatprep.subr.bf16.mxu0 %v8021_v62 }
 0x5d0   :  { %6073 = vmatpush3.bf16.msra.mxu0 %v7501_v15  ;;  %v3218_v15 = vsub.f32 1.0, %v7637_v33 }
 0x5d1   :  { %6128 = vmatprep.subr.bf16.mxu0 %v8021_v62 }
 0x5d3   :  { %5394 = vmatmul.mubr.f32.vlgmr.msra.gmra.mrb[2].mxu0 %v6938_v45  ;;  %v3227_v45 = vld [vmem:[%s7881_s5 + $0x8] sm:$0xff] }
 0x5d4   :  { %5512 = vmatprep.mubr.msk.f32.mxu0 %vm6597_vm0, %v7954_v60  ;;  %v3243_v31 = vand.u32 4294901760, %v3227_v45 }
 0x5d6   :  { %v7720_v53 = vpack.c.bf16 %v3243_v31, %v3240_v30  ;;  %v3327_v7 = vsub.f32 %v3227_v45, %v3243_v31 }
 0x5d8   :  { %6130 = vmatpush3.bf16.msra.mxu0 %v7720_v53  ;;  %v3328_v5 = vand.u32 4294901760, %v3327_v7  ;;  %v6141_v41 = vpack.c.bf16 %v3327_v7, %v3320_v57  ;;  %v3752_v57 = vld [vmem:[#allocation5] sm:$0xff] }
 0x5d9   :  { %6131 = vmatprep.subr.bf16.mxu0 %v8021_v62  ;;  %v3766_v47 = vand.u32 4294901760, %v3752_v57 }
 0x5da   :  { %v3329_v9 = vsub.f32 %v3327_v7, %v3328_v5  ;;  %v6153_v22 = vpack.c.bf16 %v3328_v5, %v3321_v51  ;;  %v3753_v7 = vld [vmem:[#allocation5 + $0x8] sm:$0xff]  ;;  %v3754_v51 = vld [vmem:[#allocation5 + $0x10] sm:$0xff]  ;;  %v3755_v5 = vld [vmem:[#allocation5 + $0x18] sm:$0xff] }
 0x5dc   :  { %v3330_v10 = vand.u32 4294901760, %v3329_v9 }
 0x5de   :  { %v6135_v25 = vpack.c.bf16 %v3330_v10, %v3323_v16 }
 0x624   :  { %v3214_v37 = vpop.permute.xlu1 %3213 }
 0x625   :  { %v3216_v14 = vadd.f32 %v7617_v0, %v3214_v37 }
 0x627   :  { %6354 = vtanh.f32 %v3216_v14 }
 0x631   :  { %v6355_v13 = vpop.eup %6354 }
 0x632   :  { %3220 = vrot.lane.b32.xlu0 %v6355_v13, %s6601_s8  ;;  %v696_v13 = vrot.slane %v7381_v63, %v695_v44  ;;  %v3769_v63 = vand.u32 4294901760, %v3753_v7 }
 0x636   :  { %3724 = vrot.lane.b32.xlu0 %v7392_v3, %s6599_s3  ;;  %v3229_v3 = vld [vmem:[%s7881_s5 + $0x18] sm:$0xff]  ;;  %s6602_s5 = smov [#allocation15]  }
 0x637   :  { %v3249_v55 = vand.u32 4294901760, %v3229_v3  ;;  %s4825_s10 = sshll.u32 %s6602_s5, 4  ;;  %s4826_s10 = int_to_ptr.vmem [resolvable:$true] %s4825_s10 }
 0x638   :  { %s6528_s18 = scalar_lea.vmem %s4826_s10, 128  ;;  %p6533_p1 = scmp.lt.s32.totalorder %s4826_s10, %s4826_s10 }
 0x639   :  { %v7731_v35 = vpack.c.bf16 %v3249_v55, %v3246_v29  ;;  %v3341_v39 = vsub.f32 %v3229_v3, %v3249_v55  ;;  %v7778_v3 = vpack.c.bf16 %v3769_v63, %v3766_v47  ;;  %v3846_v29 = vsub.f32 %v3752_v57, %v3766_v47  ;;  %p6529_p0 = scmp.ne.s32.totalorder %s4826_s10, %s6528_s18  ;;  %p6534_p2 = scmp.lt.s32.totalorder %s6528_s18, %s6528_s18 }
 0x63a   :  { %v3853_v55 = vsub.f32 %v3753_v7, %v3769_v63  ;;  %v4296_v63 = vld [vmem:[#allocation11] sm:$0xff] }
 0x63b   :  { %6133 = vmatpush3.bf16.msra.mxu0 %v7731_v35  ;;  %v3342_v28 = vand.u32 4294901760, %v3341_v39  ;;  %v6144_v50 = vpack.c.bf16 %v3341_v39, %v3334_v1  ;;  %6166 = vmatpush3.bf16.msra.mxu1 %v7778_v3  ;;  %v3775_v1 = vand.u32 4294901760, %v3755_v5  ;;  %p6535_p3 = por %p6534_p2, %p6533_p1 }
 0x63c   :  { %6134 = vmatprep.subr.bf16.mxu0 %v8021_v62  ;;  %v3854_v27 = vand.u32 4294901760, %v3853_v55  ;;  %6167 = vmatprep.subr.bf16.mxu1 %v8021_v62 }
 0x63d   :  { %v3343_v56 = vsub.f32 %v3341_v39, %v3342_v28  ;;  %v6156_v0 = vpack.c.bf16 %v3342_v28, %v3335_v36  ;;  %v3847_v39 = vand.u32 4294901760, %v3846_v29  ;;  %p6536_p4 = pnand %p6535_p3, %p6529_p0 }
 0x63e   :  { %v3855_v10 = vsub.f32 %v3853_v55, %v3854_v27 }
 0x63f   :  { %v3344_v6 = vand.u32 4294901760, %v3343_v56  ;;  %v3848_v16 = vsub.f32 %v3846_v29, %v3847_v39 }
 0x641   :  { %v6138_v38 = vpack.c.bf16 %v3344_v6, %v3337_v42  ;;  %v3849_v56 = vand.u32 4294901760, %v3848_v16  ;;  %v3856_v6 = vand.u32 4294901760, %v3855_v10 }
 0x6a4   :  { %v3221_v46 = vpop.permute.xlu0 %3220 }
 0x6a5   :  { %v3223_v4 = vmul.f32 %v3221_v46, %v3218_v15 }
 0x6a6   :  { %v2192_v11 = vpop.f32.mrb[2].mxu0 }
 0x6a7   :  { %v7739_v21 = vadd.f32 %v3224_v48, %v3223_v4  ;;  %v5395_v58 = vpop.f32.mrb[3].mxu0  ;;  %v6239_v20 = vadd.f32 %v2192_v11, %v696_v13  ;;  %v3867_v4 = vsub.f32 %v3755_v5, %v3775_v1 }
 0x6a8   :  { %v3725_v17 = vpop.permute.xlu0 %3724 }
 0x6a9   :  { %3235 = vrot.lane.b32.xlu1 %v7739_v21, %s6601_s8  ;;  %v3868_v42 = vand.u32 4294901760, %v3867_v4 }
 0x71b   :  { %v3236_v24 = vpop.permute.xlu1 %3235 }
 0x71c   :  { %v3237_v23 = vsel %vm145_vm1, %v3236_v24, 0  ;;  %v6177_v24 = vpack.c.bf16 %v3853_v55, %v3846_v29  ;;  %v4312_v29 = vand.u32 4294901760, %v4296_v63 }
 0x71d   :  { %v3308_v59 = vand.u32 4294901760, %v3237_v23 }
 0x71e   :  { %v4392_v5 = vsub.f32 %v4296_v63, %v4312_v29 }
 0x71f   :  { %v3309_v34 = vsub.f32 %v3237_v23, %v3308_v59 }
 0x721   :  { %v3310_v33 = vand.u32 4294901760, %v3309_v34 }
 0x723   :  { %v3311_v40 = vsub.f32 %v3309_v34, %v3310_v33 }
 0x725   :  { %v3312_v8 = vand.u32 4294901760, %v3311_v40 }
 0x727   :  { %5513 = vmatmul.mubr.f32.vlgmr.msra.gmra.mrb[4].mxu0 %v3312_v8 }
 0x728   :  { %6136 = vmatpush3.bf16.msra.mxu0 %v6135_v25  ;;  %5523 = vmatprep.mubr.msk.f32.mxu0 %vm6597_vm0, %v7954_v60 }
 0x729   :  { %6137 = vmatprep.subr.bf16.mxu0 %v8021_v62 }
 0x72c   :  { %6139 = vmatpush3.bf16.msra.mxu0 %v6138_v38 }
 0x72d   :  { %6140 = vmatprep.subr.bf16.mxu0 %v8021_v62 }
 0x72f   :  { %5524 = vmatmul.mubr.f32.vlgmr.msra.gmra.mrb[4].mxu0 %v3308_v59 }
 0x730   :  { %6142 = vmatpush3.bf16.msra.mxu0 %v6141_v41  ;;  %5534 = vmatprep.mubr.msk.f32.mxu0 %vm6597_vm0, %v7954_v60 }
 0x731   :  { %6143 = vmatprep.subr.bf16.mxu0 %v8021_v62 }
 0x734   :  { %6145 = vmatpush3.bf16.msra.mxu0 %v6144_v50  ;;  %v3869_v50 = vsub.f32 %v3867_v4, %v3868_v42 }
 0x735   :  { %6146 = vmatprep.subr.bf16.mxu0 %v8021_v62 }
 0x736   :  { %v3870_v11 = vand.u32 4294901760, %v3869_v50 }
 0x737   :  { %5535 = vmatmul.mubr.f32.vlgmr.msra.gmra.mrb[4].mxu0 %v3309_v34 }
 0x738   :  { %6148 = vmatpush3.bf16.msra.mxu0 %v7720_v53  ;;  %5545 = vmatprep.mubr.msk.f32.mxu0 %vm6597_vm0, %v7954_v60 }
 0x739   :  { %6149 = vmatprep.subr.bf16.mxu0 %v8021_v62 }
 0x73c   :  { %6151 = vmatpush3.bf16.msra.mxu0 %v7731_v35 }
 0x73d   :  { %6152 = vmatprep.subr.bf16.mxu0 %v8021_v62 }
 0x73f   :  { %5546 = vmatmul.mubr.f32.vlgmr.msra.gmra.mrb[4].mxu0 %v3310_v33 }
 0x740   :  { %6154 = vmatpush3.bf16.msra.mxu0 %v6153_v22  ;;  %5556 = vmatprep.mubr.msk.f32.mxu0 %vm6597_vm0, %v7954_v60  ;;  %v6171_v22 = vpack.c.bf16 %v3856_v6, %v3849_v56 }
 0x741   :  { %6155 = vmatprep.subr.bf16.mxu0 %v8021_v62 }
 0x744   :  { %6157 = vmatpush3.bf16.msra.mxu0 %v6156_v0 }
 0x745   :  { %6158 = vmatprep.subr.bf16.mxu0 %v8021_v62 }
 0x747   :  { %5557 = vmatmul.mubr.f32.vlgmr.msra.gmra.mrb[4].mxu0 %v3308_v59 }
 0x748   :  { %6160 = vmatpush3.bf16.msra.mxu0 %v7720_v53  ;;  %5567 = vmatprep.mubr.msk.f32.mxu0 %vm6597_vm0, %v7954_v60 }
 0x749   :  { %6161 = vmatprep.subr.bf16.mxu0 %v8021_v62 }
 0x74c   :  { %6163 = vmatpush3.bf16.msra.mxu0 %v7731_v35  ;;  %v3772_v35 = vand.u32 4294901760, %v3754_v51 }
 0x74d   :  { %6200 = vmatprep.subr.bf16.mxu0 %v8021_v62 }
 0x74e   :  { %v6168_v46 = vpack.c.bf16 %v3775_v1, %v3772_v35  ;;  %v3860_v9 = vsub.f32 %v3754_v51, %v3772_v35  ;;  %v4298_v35 = vld [vmem:[#allocation11 + $0x10] sm:$0xff]  ;;  %v4299_v1 = vld [vmem:[#allocation11 + $0x18] sm:$0xff] }
 0x74f   :  { %5568 = vmatmul.mubr.f32.vlgmr.msra.gmra.mrb[4].mxu0 %v3308_v59  ;;  %v6189_v59 = vpack.c.bf16 %v3854_v27, %v3847_v39  ;;  %v4321_v27 = vand.u32 4294901760, %v4299_v1 }
 0x750   :  { %5644 = vmatprep.mubr.msk.f32.mxu0 %vm6597_vm0, %v7954_v60  ;;  %6169 = vmatpush3.bf16.msra.mxu1 %v6168_v46  ;;  %v3861_v25 = vand.u32 4294901760, %v3860_v9  ;;  %v6180_v23 = vpack.c.bf16 %v3867_v4, %v3860_v9 }
 0x751   :  { %6170 = vmatprep.subr.bf16.mxu1 %v8021_v62 }
 0x752   :  { %v3862_v41 = vsub.f32 %v3860_v9, %v3861_v25  ;;  %v6192_v34 = vpack.c.bf16 %v3868_v42, %v3861_v25 }
 0x754   :  { %v3863_v0 = vand.u32 4294901760, %v3862_v41 }
 0x756   :  { %v6174_v58 = vpack.c.bf16 %v3870_v11, %v3863_v0 }
 0x822   :  { %v3720_v61 = vpop.f32.mrb[4].mxu0 }
 0x823   :  { %v6242_v49 = vadd.f32 %v3720_v61, %v3233_v26  ;;  %v5569_v18 = vpop.f32.mrb[5].mxu0 }
 0x824   :  { %v3758_v18 = vsub.s32 3, %v7378_v2 }
 0x825   :  { %v3727_v54 = vadd.f32 %v6242_v49, %v3725_v17  ;;  %v6373_v17 = vld [vmem:[#allocation7] sm:$0xf] }
 0x827   :  { %v4847_v52 = vmul.f32 -1.442695, %v3727_v54  ;;  %v3759_v54 = vrot.slane %v6373_v17, %v3758_v18 }
 0x829   :  { %6356 = vpow2.f32 %v4847_v52 }
 0x833   :  { %v6357_v37 = vpop.eup %6356 }
 0x834   :  { %v3731_v14 = vadd.f32 1.0, %v6357_v37 }
 0x836   :  { %6358 = vrcp.f32 %v3731_v14 }
 0x840   :  { %v6359_v45 = vpop.eup %6358 }
 0x841   :  { %v3734_v30 = vmul.f32 %v6359_v45, %v6239_v20  ;;  %v3741_v48 = vsub.f32 1.0, %v6359_v45 }
 0x843   :  { %3736 = vrot.lane.b32.xlu1 %v3734_v30, %s6599_s3 }
 0x847   :  { %3747 = vrot.lane.b32.xlu1 %v7733_v19, %s6601_s8 }
 0x84b   :  { %4251 = vrot.lane.b32.xlu1 %v6239_v20, %s6601_s8 }
 0x8b5   :  { %v3737_v43 = vpop.permute.xlu1 %3736 }
 0x8b6   :  { %v3739_v31 = vadd.f32 %v6242_v49, %v3737_v43 }
 0x8b8   :  { %6360 = vtanh.f32 %v3739_v31 }
 0x8b9   :  { %v3748_v15 = vpop.permute.xlu1 %3747 }
 0x8ba   :  { %v3750_v36 = vmul.f32 %v6359_v45, %v3748_v15 }
 0x8bd   :  { %v4252_v13 = vpop.permute.xlu1 %4251 }
 0x8c2   :  { %v6361_v53 = vpop.eup %6360 }
 0x8c3   :  { %3743 = vrot.lane.b32.xlu0 %v6361_v53, %s6601_s8 }
 0x935   :  { %v3744_v28 = vpop.permute.xlu0 %3743 }
 0x936   :  { %v3746_v32 = vmul.f32 %v3744_v28, %v3741_v48  ;;  %v4393_v48 = vand.u32 4294901760, %v4392_v5 }
 0x938   :  { %v7783_v38 = vadd.f32 %v3750_v36, %v3746_v32  ;;  %v4413_v36 = vsub.f32 %v4299_v1, %v4321_v27  ;;  %v4394_v28 = vsub.f32 %v4392_v5, %v4393_v48 }
 0x93a   :  { %3761 = vrot.lane.b32.xlu0 %v7783_v38, %s6601_s8  ;;  %v4395_v42 = vand.u32 4294901760, %v4394_v28  ;;  %v4414_v41 = vand.u32 4294901760, %v4413_v36 }
 0x93c   :  { %v4415_v11 = vsub.f32 %v4413_v36, %v4414_v41 }
 0x93e   :  { %4261 = vrot.lane.b32.xlu0 %v6239_v20, %s6600_s15 }
 0x9ac   :  { %v3762_v33 = vpop.permute.xlu0 %3761 }
 0x9ad   :  { %v3763_v40 = vsel %vm145_vm1, %v3762_v33, 0 }
 0x9ae   :  { %v3834_v8 = vand.u32 4294901760, %v3763_v40 }
 0x9b0   :  { %v3835_v44 = vsub.f32 %v3763_v40, %v3834_v8  ;;  %v4262_v53 = vpop.permute.xlu0 %4261 }
 0x9b2   :  { %v3836_v26 = vand.u32 4294901760, %v3835_v44 }
 0x9b4   :  { %v3837_v61 = vsub.f32 %v3835_v44, %v3836_v26 }
 0x9b6   :  { %v3838_v49 = vand.u32 4294901760, %v3837_v61 }
 0x9b8   :  { %5579 = vmatmul.mubr.f32.vlgmr.msra.gmra.mrb[8].mxu1 %v3838_v49 }
 0x9b9   :  { %6172 = vmatpush3.bf16.msra.mxu1 %v6171_v22  ;;  %5589 = vmatprep.mubr.msk.f32.mxu1 %vm6597_vm0, %v7954_v60 }
 0x9ba   :  { %6173 = vmatprep.subr.bf16.mxu1 %v8021_v62 }
 0x9bd   :  { %6175 = vmatpush3.bf16.msra.mxu1 %v6174_v58 }
 0x9be   :  { %6176 = vmatprep.subr.bf16.mxu1 %v8021_v62 }
 0x9c0   :  { %5590 = vmatmul.mubr.f32.vlgmr.msra.gmra.mrb[8].mxu1 %v3834_v8 }
 0x9c1   :  { %6178 = vmatpush3.bf16.msra.mxu1 %v6177_v24  ;;  %5600 = vmatprep.mubr.msk.f32.mxu1 %vm6597_vm0, %v7954_v60 }
 0x9c2   :  { %6179 = vmatprep.subr.bf16.mxu1 %v8021_v62 }
 0x9c5   :  { %6181 = vmatpush3.bf16.msra.mxu1 %v6180_v23  ;;  %v4416_v23 = vand.u32 4294901760, %v4415_v11 }
 0x9c6   :  { %6182 = vmatprep.subr.bf16.mxu1 %v8021_v62 }
 0x9c8   :  { %5601 = vmatmul.mubr.f32.vlgmr.msra.gmra.mrb[8].mxu1 %v3835_v44 }
 0x9c9   :  { %6184 = vmatpush3.bf16.msra.mxu1 %v7778_v3  ;;  %5611 = vmatprep.mubr.msk.f32.mxu1 %vm6597_vm0, %v7954_v60 }
 0x9ca   :  { %6185 = vmatprep.subr.bf16.mxu1 %v8021_v62 }
 0x9cd   :  { %6187 = vmatpush3.bf16.msra.mxu1 %v6168_v46 }
 0x9ce   :  { %6188 = vmatprep.subr.bf16.mxu1 %v8021_v62 }
 0x9d0   :  { %5612 = vmatmul.mubr.f32.vlgmr.msra.gmra.mrb[8].mxu1 %v3836_v26 }
 0x9d1   :  { %6190 = vmatpush3.bf16.msra.mxu1 %v6189_v59  ;;  %5622 = vmatprep.mubr.msk.f32.mxu1 %vm6597_vm0, %v7954_v60 }
 0x9d2   :  { %6191 = vmatprep.subr.bf16.mxu1 %v8021_v62 }
 0x9d5   :  { %6193 = vmatpush3.bf16.msra.mxu1 %v6192_v34 }
 0x9d6   :  { %6194 = vmatprep.subr.bf16.mxu1 %v8021_v62 }
 0x9d8   :  { %5623 = vmatmul.mubr.f32.vlgmr.msra.gmra.mrb[8].mxu1 %v3834_v8 }
 0x9d9   :  { %6196 = vmatpush3.bf16.msra.mxu1 %v7778_v3  ;;  %5633 = vmatprep.mubr.msk.f32.mxu1 %vm6597_vm0, %v7954_v60  ;;  %v4297_v3 = vld [vmem:[#allocation11 + $0x8] sm:$0xff] }
 0x9da   :  { %6197 = vmatprep.subr.bf16.mxu1 %v8021_v62  ;;  %v4315_v55 = vand.u32 4294901760, %v4297_v3 }
 0x9dc   :  { %v7815_v51 = vpack.c.bf16 %v4315_v55, %v4312_v29  ;;  %v4399_v15 = vsub.f32 %v4297_v3, %v4315_v55 }
 0x9dd   :  { %6199 = vmatpush3.bf16.msra.mxu1 %v6168_v46 }
 0x9de   :  { %6202 = vmatpush3.bf16.msra.mxu0 %v7815_v51  ;;  %v4400_v46 = vand.u32 4294901760, %v4399_v15  ;;  %v6213_v34 = vpack.c.bf16 %v4399_v15, %v4392_v5 }
 0x9df   :  { %6203 = vmatprep.subr.bf16.mxu0 %v8021_v62 }
 0x9e0   :  { %5634 = vmatmul.mubr.f32.vlgmr.msra.gmra.mrb[8].mxu1 %v3834_v8  ;;  %v4401_v56 = vsub.f32 %v4399_v15, %v4400_v46  ;;  %v6225_v40 = vpack.c.bf16 %v4400_v46, %v4393_v48 }
 0x9e2   :  { %v4402_v50 = vand.u32 4294901760, %v4401_v56 }
 0x9e4   :  { %v6207_v58 = vpack.c.bf16 %v4402_v50, %v4395_v42 }
 0xab3   :  { %v4246_v52 = vpop.f32.mrb[8].mxu1 }
 0xab4   :  { %v6243_v37 = vadd.f32 %v4246_v52, %v3759_v54  ;;  %v5635_v14 = vpop.f32.mrb[9].mxu1  ;;  %v4849_v52 = vld [vmem:[#allocation13] ss:$0 sm:$0xff] }
 0xab6   :  { %v4254_v20 = vadd.f32 %v6243_v37, %v4252_v13 }
 0xab8   :  { %v4848_v45 = vmul.f32 -1.442695, %v4254_v20 }
 0xaba   :  { %6362 = vpow2.f32 %v4848_v45 }
 0xac4   :  { %v6363_v30 = vpop.eup %6362 }
 0xac5   :  { %v4258_v43 = vadd.f32 1.0, %v6363_v30 }
 0xac7   :  { %6364 = vrcp.f32 %v4258_v43 }
 0xad1   :  { %v6365_v31 = vpop.eup %6364 }
 0xad2   :  { %v4264_v57 = vmul.f32 %v6365_v31, %v4262_v53  ;;  %v4271_v9 = vsub.f32 1.0, %v6365_v31  ;;  %v4290_v53 = vsel %vm145_vm1, %v7421_v12, %v7739_v21 }
 0xad4   :  { %4266 = vrot.lane.b32.xlu1 %v4264_v57, %s6599_s3 }
 0xad8   :  { %4277 = vrot.lane.b32.xlu1 %v7733_v19, %s6599_s3  ;;  %v4318_v19 = vand.u32 4294901760, %v4298_v35 }
 0xada   :  { %v6204_v4 = vpack.c.bf16 %v4321_v27, %v4318_v19  ;;  %v4406_v16 = vsub.f32 %v4298_v35, %v4318_v19 }
 0xadc   :  { %6205 = vmatpush3.bf16.msra.mxu0 %v6204_v4  ;;  %v4407_v6 = vand.u32 4294901760, %v4406_v16  ;;  %v6216_v33 = vpack.c.bf16 %v4413_v36, %v4406_v16 }
 0xadd   :  { %6206 = vmatprep.subr.bf16.mxu0 %v8021_v62 }
 0xade   :  { %v4408_v0 = vsub.f32 %v4406_v16, %v4407_v6  ;;  %v6228_v8 = vpack.c.bf16 %v4414_v41, %v4407_v6 }
 0xae0   :  { %v4409_v24 = vand.u32 4294901760, %v4408_v0 }
 0xae2   :  { %v6210_v59 = vpack.c.bf16 %v4416_v23, %v4409_v24 }
 0xb46   :  { %v4267_v2 = vpop.permute.xlu1 %4266 }
 0xb47   :  { %v4269_v7 = vadd.f32 %v6243_v37, %v4267_v2 }
 0xb49   :  { %6366 = vtanh.f32 %v4269_v7 }
 0xb4a   :  { %v4278_v39 = vpop.permute.xlu1 %4277 }
 0xb4b   :  { %v4280_v10 = vmul.f32 %v6365_v31, %v4278_v39 }
 0xb53   :  { %v6367_v47 = vpop.eup %6366 }
 0xb54   :  { %4273 = vrot.lane.b32.xlu0 %v6367_v47, %s6601_s8 }
 0xbc6   :  { %v4274_v32 = vpop.permute.xlu0 %4273 }
 0xbc7   :  { %v4276_v25 = vmul.f32 %v4274_v32, %v4271_v9 }
 0xbc9   :  { %v4281_v22 = vadd.f32 %v4280_v10, %v4276_v25 }
 0xbcb   :  { %4307 = vrot.lane.b32.xlu0 %v4281_v22, %s6601_s8 }
 0xc3d   :  { %v4308_v44 = vpop.permute.xlu0 %4307 }
 0xc3e   :  { %v4309_v26 = vsel %vm145_vm1, %v4308_v44, 0 }
 0xc3f   :  { %v4380_v61 = vand.u32 4294901760, %v4309_v26 }
 0xc41   :  { %v4381_v49 = vsub.f32 %v4309_v26, %v4380_v61 }
 0xc43   :  { %v4382_v18 = vand.u32 4294901760, %v4381_v49 }
 0xc45   :  { %v4383_v17 = vsub.f32 %v4381_v49, %v4382_v18 }
 0xc47   :  { %v4384_v54 = vand.u32 4294901760, %v4383_v17 }
 0xc49   :  { %5645 = vmatmul.mubr.f32.vlgmr.msra.gmra.mrb[6].mxu0 %v4384_v54 }
 0xc4a   :  { %6208 = vmatpush3.bf16.msra.mxu0 %v6207_v58  ;;  %5655 = vmatprep.mubr.msk.f32.mxu0 %vm6597_vm0, %v7954_v60 }
 0xc4b   :  { %6209 = vmatprep.subr.bf16.mxu0 %v8021_v62 }
 0xc4e   :  { %6211 = vmatpush3.bf16.msra.mxu0 %v6210_v59 }
 0xc4f   :  { %6212 = vmatprep.subr.bf16.mxu0 %v8021_v62 }
 0xc51   :  { %5656 = vmatmul.mubr.f32.vlgmr.msra.gmra.mrb[6].mxu0 %v4380_v61 }
 0xc52   :  { %6214 = vmatpush3.bf16.msra.mxu0 %v6213_v34  ;;  %5666 = vmatprep.mubr.msk.f32.mxu0 %vm6597_vm0, %v7954_v60 }
 0xc53   :  { %6215 = vmatprep.subr.bf16.mxu0 %v8021_v62 }
 0xc56   :  { %6217 = vmatpush3.bf16.msra.mxu0 %v6216_v33 }
 0xc57   :  { %6218 = vmatprep.subr.bf16.mxu0 %v8021_v62 }
 0xc59   :  { %5667 = vmatmul.mubr.f32.vlgmr.msra.gmra.mrb[6].mxu0 %v4381_v49 }
 0xc5a   :  { %6220 = vmatpush3.bf16.msra.mxu0 %v7815_v51  ;;  %5677 = vmatprep.mubr.msk.f32.mxu0 %vm6597_vm0, %v7954_v60 }
 0xc5b   :  { %6221 = vmatprep.subr.bf16.mxu0 %v8021_v62 }
 0xc5e   :  { %6223 = vmatpush3.bf16.msra.mxu0 %v6204_v4 }
 0xc5f   :  { %6224 = vmatprep.subr.bf16.mxu0 %v8021_v62 }
 0xc61   :  { %5678 = vmatmul.mubr.f32.vlgmr.msra.gmra.mrb[6].mxu0 %v4382_v18 }
 0xc62   :  { %6226 = vmatpush3.bf16.msra.mxu0 %v6225_v40  ;;  %5688 = vmatprep.mubr.msk.f32.mxu0 %vm6597_vm0, %v7954_v60 }
 0xc63   :  { %6227 = vmatprep.subr.bf16.mxu0 %v8021_v62 }
 0xc66   :  { %6229 = vmatpush3.bf16.msra.mxu0 %v6228_v8 }
 0xc67   :  { %6230 = vmatprep.subr.bf16.mxu0 %v8021_v62 }
 0xc69   :  { %5689 = vmatmul.mubr.f32.vlgmr.msra.gmra.mrb[6].mxu0 %v4380_v61 }
 0xc6a   :  { %6232 = vmatpush3.bf16.msra.mxu0 %v7815_v51  ;;  %5699 = vmatprep.mubr.msk.f32.mxu0 %vm6597_vm0, %v7954_v60 }
 0xc6b   :  { %6233 = vmatprep.subr.bf16.mxu0 %v8021_v62 }
 0xc6e   :  { %6235 = vmatpush3.bf16.msra.mxu0 %v6204_v4 }
 0xc71   :  { %5700 = vmatmul.mubr.f32.vlgmr.msra.gmra.mrb[6].mxu0 %v4380_v61 }
 0xd44   :  { %v4792_v37 = vpop.f32.mrb[6].mxu0 }
 0xd45   :  { %v6244_v14 = vadd.f32 %v4849_v52, %v4792_v37  ;;  %v5701_v13 = vpop.f32.mrb[7].mxu0 }
 0xd47   :  { %v4796_v20 = vsel %vm145_vm1, %v6244_v14, -inf }
 0xd48   :  { %4797 = vmax.xlane.f32.xlu1 %v4796_v20 }
 0xd59   :  { %4287 = vrot.lane.b32.xlu1 %v4281_v22, %s6599_s3 }
 0xdd5   :  { %v4798_v45 = vpop.xlane.xlu1 %4797 }
 0xdd6   :  { %v4799_v30 = vsub.f32 %v6244_v14, %v4798_v45 }
 0xdd8   :  { %v4800_v43 = vmul.f32 1.442695, %v4799_v30 }
 0xdd9   :  { %v4288_v2 = vpop.permute.xlu1 %4287 }
 0xdda   :  { %6368 = vpow2.f32 %v4800_v43 }
 0xde4   :  { %v6369_v31 = vpop.eup %6368 }
 0xde5   :  { %v4802_v60 = vsel %vm145_vm1, %v6369_v31, 0.0 }
 0xde6   :  { %4803 = vadd.xlane.f32.xlu0 %v4802_v60 }
 0xdfc   :  { %4283 = vrot.lane.b32.xlu0 %v7783_v38, %s6600_s15 }
 0xe73   :  { %v4804_v62 = vpop.xlane.xlu0 %4803 }
 0xe74   :  { %6370 = vlog2.f32 %v4804_v62 }
 0xe77   :  { %v4284_v57 = vpop.permute.xlu0 %4283 }
 0xe78   :  { %v4292_v7 = vsel %vm4291_vm4, %v4290_v53, %v4284_v57 }
 0xe79   :  { %v4294_v47 = vsel %vm4293_vm5, %v4292_v7, %v4288_v2 }
 0xe7a   :  { %4295 = vst [vmem:[#allocation15] sm:$0xff] %v4294_v47 }
 0xe7b   :  { %6539 = shalt.err (!%p6536_p4)
}
 0xe7c   :  { %s6540_s7 = scalar_lea.hbm %s7889_s13, 128 }
 0xe7d   :  { %p6541_p5 = scmp.ne.s32.totalorder %s7889_s13, %s6540_s7  ;;  %p6544_p6 = scmp.lt.u32.totalorder %s6540_s7, %s7889_s13 }
 0xe7f   :  { %p6546_p7 = pnand %p6544_p6, %p6541_p5 }
 0xe81   :  { %6549 = shalt.err (!%p6546_p7)
}
 0xe82   :  { %4828 = dma.vmem_to_hbm [thread:$0]  %s4826_s10, 128, %s7889_s13, [#allocation16]   ;;  %v6371_v12 = vpop.eup %6370 }
 0xe83   :  { %s6603_s8 = smov [#allocation14]   ;;  %v4806_v21 = vmul.f32 0.6931472, %v6371_v12 }
 0xe84   :  { %s4815_s23 = sshll.u32 %s6603_s8, 4  ;;  %s4816_s23 = int_to_ptr.vmem [resolvable:$true] %s4815_s23 }
 0xe85   :  { %v4807_v38 = vsub.f32 %v4799_v30, %v4806_v21  ;;  %s6550_s6 = scalar_lea.vmem %s4816_s23, 128  ;;  %p6555_p9 = scmp.lt.s32.totalorder %s4816_s23, %s4816_s23 }
 0xe86   :  { %p6551_p8 = scmp.ne.s32.totalorder %s4816_s23, %s6550_s6  ;;  %p6556_p10 = scmp.lt.s32.totalorder %s6550_s6, %s6550_s6 }
 0xe87   :  { %4808 = vst.msk [vmem:[#allocation14] sm:$0xff] %vm145_vm1, %v4807_v38 }
 0xe88   :  { %p6557_p11 = por %p6556_p10, %p6555_p9 }
 0xe8a   :  { %p6558_p12 = pnand %p6557_p11, %p6551_p8 }
 0xe8c   :  { %6561 = shalt.err (!%p6558_p12)
}
 0xe8d   :  { %s6562_s1 = scalar_lea.hbm %s7888_s12, 128 }
 0xe8e   :  { %p6563_p13 = scmp.ne.s32.totalorder %s7888_s12, %s6562_s1  ;;  %p6566_p0 = scmp.lt.u32.totalorder %s6562_s1, %s7888_s12 }
 0xe90   :  { %p6568_p1 = pnand %p6566_p0, %p6563_p13 }
 0xe92   :  { %6571 = shalt.err (!%p6568_p1)
}
 0xe93   :  { %4818 = dma.vmem_to_hbm [thread:$0]  %s4816_s23, 128, %s7888_s12, [#allocation4]  }
 0xe94   :  { %6580 = dma.done.wait [#allocation4], 128  }
 0xe95   :  { %6581 = vsyncadd [#allocation4], 4294967168 }
 0xe96   :  { %6582 = dma.done.wait [#allocation16], 128  }
 0xe97   :  { %6583 = vsyncadd [#allocation16], 4294967168 }
 0xe98   :  { %4835 = vsyncpa [#allocation3], 1 }
 0xe99   :  { %4836 = vsyncpa [#allocation6], 1 }
 0xe9a   :  { %4837 = vsyncpa [#allocation9], 1 }
 0xe9b   :  { %4838 = vsyncpa [#allocation12], 1 }
 0xe9c   :  { %4839 = vsyncpa [#allocation4], 1 }
 0xe9d   :  { %4840 = vsyncpa [#allocation16], 1 }

</bundles_post_ra>
